<compile_context>
chip_gen: v5e
topology: v5e:2x2
jax: 0.10.0
libtpu: 0.0.40
codegen_flags: <defaults>
</compile_context>

<pallas_src>
import jax
import jax.numpy as jnp
from jax.experimental import pallas as pl
from jax.experimental.pallas import tpu as pltpu


# (C_in, C_out, K, stride) for the three ConvBlocks of Decoder
DECODER_CFG = [
    (38, 24, 6, 2),
    (24, 12, 6, 5),
    (12, 1, 12, 1),
]
BN_EPS = 1e-5


# ----------------------------------------------------------------------------
# Fused decoder kernel factory (static shapes derived from the input length)
# ----------------------------------------------------------------------------
def _make_fused_decoder(L_in):
    blocks = []
    L = L_in
    for (c_in, c_out, K, stride) in DECODER_CFG:
        L_full = L - K + 1                      # stride-1 ("full") conv length
        L_out = (L - K) // stride + 1           # true conv output length
        blocks.append(dict(c_in=c_in, c_out=c_out, K=K, stride=stride,
                           L_in=L, L_full=L_full, L_out=L_out))
        L = L_out
    L_final = L

    def kernel(*refs):
        # refs: x_ref, then per block (w_ref, shift_ref[, sel_ref]), then o_ref
        x_ref = refs[0]
        o_ref = refs[-1]
        idx = 1
        h = x_ref[...]                          # (C_in0, L_in0), f32, lane = L
        for blk in blocks:
            w_ref = refs[idx]; idx += 1         # (K, C_out, C_in), BN-scale folded
            sh_ref = refs[idx]; idx += 1        # (C_out, 1)
            sel_ref = None
            if blk["stride"] > 1:
                sel_ref = refs[idx]; idx += 1   # (L_full, L_out) 0/1 selection
            K = blk["K"]
            L_full = blk["L_full"]
            acc = jnp.zeros((blk["c_out"], L_full), jnp.float32)
            # K shifted contiguous slices -> K small MXU matmuls (static unroll)
            for k in range(K):
                acc = acc + jnp.dot(w_ref[k], h[:, k:k + L_full],
                                    preferred_element_type=jnp.float32)
            if sel_ref is not None:
                # stride-s column subsample as an exact 0/1 matmul (keeps the
                # lane axis dense, avoids strided VMEM reads)
                acc = jnp.dot(acc, sel_ref[...],
                              preferred_element_type=jnp.float32)
            h = jax.nn.sigmoid(acc + sh_ref[...])
        o_ref[...] = h                          # (1, L_final)

    return blocks, kernel, L_final


# ----------------------------------------------------------------------------
# Wrapper: fold BN into weights, build selection matrices, one pallas_call
# ----------------------------------------------------------------------------
def decoder_forward_pallas(x, params):
    """x: (N, 38, L_in) float32 -> (N, 1, L_final) float32 (NCL layout)."""
    N, C0, L_in = x.shape
    blocks, kernel, L_final = _make_fused_decoder(L_in)

    operands = [x]
    in_specs = [pl.BlockSpec((None, C0, L_in), lambda n: (n, 0, 0))]

    for p, blk in zip(params, blocks):
        scale = p["gamma"] / jnp.sqrt(p["running_var"] + BN_EPS)      # (C_out,)
        shift = p["beta"] + (p["b"] - p["running_mean"]) * scale      # (C_out,)
        w_folded = p["w"] * scale[:, None, None]                      # (C_out, C_in, K)
        w_k = jnp.transpose(w_folded, (2, 0, 1))                      # (K, C_out, C_in)

        operands.append(w_k)
        in_specs.append(pl.BlockSpec(w_k.shape, lambda n: (0, 0, 0)))
        operands.append(shift.reshape(blk["c_out"], 1))
        in_specs.append(pl.BlockSpec((blk["c_out"], 1), lambda n: (0, 0)))
        if blk["stride"] > 1:
            sel = (jnp.arange(blk["L_full"])[:, None]
                   == blk["stride"] * jnp.arange(blk["L_out"])[None, :]
                   ).astype(jnp.float32)                              # (L_full, L_out)
            operands.append(sel)
            in_specs.append(pl.BlockSpec(sel.shape, lambda n: (0, 0)))

    c_last = blocks[-1]["c_out"]

    flops = 0
    transcendentals = 0
    for blk in blocks:
        flops += 2 * N * blk["c_out"] * blk["c_in"] * blk["K"] * blk["L_full"]
        if blk["stride"] > 1:
            flops += 2 * N * blk["c_out"] * blk["L_full"] * blk["L_out"]
        transcendentals += N * blk["c_out"] * blk["L_out"]
    bytes_accessed = 4 * (sum(int(o.size) for o in operands)
                          + N * c_last * L_final)

    out = pl.pallas_call(
        kernel,
        out_shape=jax.ShapeDtypeStruct((N, c_last, L_final), jnp.float32),
        grid=(N,),
        in_specs=in_specs,
        out_specs=pl.BlockSpec((None, c_last, L_final), lambda n: (n, 0, 0)),
        compiler_params=pltpu.CompilerParams(
            dimension_semantics=("parallel",)),
        cost_estimate=pl.CostEstimate(flops=int(flops),
                                      transcendentals=int(transcendentals),
                                      bytes_accessed=int(bytes_accessed)),
    )(*operands)
    return out


# ----------------------------------------------------------------------------
# Pure-JAX reference (for correctness check)
# ----------------------------------------------------------------------------
def conv_block_ref(x, w, b, gamma, beta, running_mean, running_var, stride,
                   eps=BN_EPS):
    z = jax.lax.conv_general_dilated(
        x, w, window_strides=(stride,), padding='VALID',
        dimension_numbers=('NCH', 'OIH', 'NCH'))
    z = z + b[None, :, None]
    zn = (z - running_mean[None, :, None]) / jnp.sqrt(
        running_var[None, :, None] + eps)
    zn = zn * gamma[None, :, None] + beta[None, :, None]
    return jax.nn.sigmoid(zn)


def decoder_forward_ref(x, params):
    for p, (_, _, _, stride) in zip(params, DECODER_CFG):
        x = conv_block_ref(x, p["w"], p["b"], p["gamma"], p["beta"],
                           p["running_mean"], p["running_var"], stride)
    return x


# ----------------------------------------------------------------------------
# Parameter init (matches PyTorch module structure; eval-mode BN stats)
# ----------------------------------------------------------------------------
def init_decoder_params(key):
    params = []
    for (c_in, c_out, k, _stride) in DECODER_CFG:
        key, kw, kb, kg, kbe, km, kv = jax.random.split(key, 7)
        params.append(dict(
            w=(jax.random.normal(kw, (c_out, c_in, k), jnp.float32) * 0.1),
            b=(jax.random.normal(kb, (c_out,), jnp.float32) * 0.1),
            gamma=(1.0 + 0.1 * jax.random.normal(kg, (c_out,), jnp.float32)),
            beta=(0.1 * jax.random.normal(kbe, (c_out,), jnp.float32)),
            running_mean=(0.1 * jax.random.normal(km, (c_out,), jnp.float32)),
            running_var=(1.0 + 0.1 * jnp.abs(
                jax.random.normal(kv, (c_out,), jnp.float32))),
        ))
    return params


if __name__ == "__main__":
    key = jax.random.PRNGKey(0)
    key, kx = jax.random.split(key)

    # input: (batch=2, channels=38, length=256)  -> output (2, 1, 14)
    x = jax.random.normal(kx, (2, 38, 256), jnp.float32)
    params = init_decoder_params(key)

    fwd = jax.jit(decoder_forward_pallas)
    out = jax.block_until_ready(fwd(x, params))

    ref = jax.block_until_ready(decoder_forward_ref(x, params))

    assert out.shape == (2, 1, 14), out.shape
    max_err = float(jnp.max(jnp.abs(out - ref)))
    assert jnp.allclose(out, ref, atol=5e-5, rtol=1e-5), max_err

    print("KERNEL_OK")
</pallas_src>

<mosaic_0001>
module attributes {stable_mosaic.version = 11 : i64} {
  func.func @kernel(%arg0: i32, %arg1: memref<1x38x256xf32, #tpu.memory_space<vmem>>, %arg2: memref<6x24x38xf32, #tpu.memory_space<vmem>>, %arg3: memref<24x1xf32, #tpu.memory_space<vmem>>, %arg4: memref<251x126xf32, #tpu.memory_space<vmem>>, %arg5: memref<6x12x24xf32, #tpu.memory_space<vmem>>, %arg6: memref<12x1xf32, #tpu.memory_space<vmem>>, %arg7: memref<121x25xf32, #tpu.memory_space<vmem>>, %arg8: memref<12x1x12xf32, #tpu.memory_space<vmem>>, %arg9: memref<1x1xf32, #tpu.memory_space<vmem>>, %arg10: memref<1x1x14xf32, #tpu.memory_space<vmem>>) attributes {dimension_semantics = [#tpu.dimension_semantics<parallel>], iteration_bounds = array<i64: 2>, scalar_prefetch = 0 : i64, scratch_operands = 0 : i64, tpu.core_type = #tpu.core_type<tc>, window_params = [{transform_indices = @transform_0, window_bounds = array<i64: 1, 38, 256>}, {pipeline_mode = #tpu.pipeline_mode<synchronous>, transform_indices = @transform_1, window_bounds = array<i64: 6, 24, 38>}, {pipeline_mode = #tpu.pipeline_mode<synchronous>, transform_indices = @transform_2, window_bounds = array<i64: 24, 1>}, {pipeline_mode = #tpu.pipeline_mode<synchronous>, transform_indices = @transform_3, window_bounds = array<i64: 251, 126>}, {pipeline_mode = #tpu.pipeline_mode<synchronous>, transform_indices = @transform_4, window_bounds = array<i64: 6, 12, 24>}, {pipeline_mode = #tpu.pipeline_mode<synchronous>, transform_indices = @transform_5, window_bounds = array<i64: 12, 1>}, {pipeline_mode = #tpu.pipeline_mode<synchronous>, transform_indices = @transform_6, window_bounds = array<i64: 121, 25>}, {pipeline_mode = #tpu.pipeline_mode<synchronous>, transform_indices = @transform_7, window_bounds = array<i64: 12, 1, 12>}, {pipeline_mode = #tpu.pipeline_mode<synchronous>, transform_indices = @transform_8, window_bounds = array<i64: 1, 1>}, {transform_indices = @transform_9, window_bounds = array<i64: 1, 1, 14>}]} {
    %c0 = arith.constant 0 : index
    %c0_0 = arith.constant 0 : index
    %c0_1 = arith.constant 0 : index
    %0 = vector.load %arg1[%c0, %c0_0, %c0_1] : memref<1x38x256xf32, #tpu.memory_space<vmem>>, vector<1x38x256xf32>
    %1 = vector.shape_cast %0 : vector<1x38x256xf32> to vector<38x256xf32>
    %cst = arith.constant 0.000000e+00 : f32
    %2 = vector.broadcast %cst : f32 to vector<24x251xf32>
    %c0_2 = arith.constant 0 : index
    %c0_3 = arith.constant 0 : index
    %c0_4 = arith.constant 0 : index
    %3 = vector.load %arg2[%c0_2, %c0_3, %c0_4] : memref<6x24x38xf32, #tpu.memory_space<vmem>>, vector<1x24x38xf32>
    %4 = vector.shape_cast %3 : vector<1x24x38xf32> to vector<24x38xf32>
    %5 = vector.extract_strided_slice %1 {offsets = [0, 0], sizes = [38, 251], strides = [1, 1]} : vector<38x256xf32> to vector<38x251xf32>
    %cst_5 = arith.constant dense<0.000000e+00> : vector<24x251xf32>
    %6 = tpu.matmul %4, %5, %cst_5 {dimension_numbers = #tpu.dot_dimension_numbers<[1], [0], [0], [1], [0, 0, 1, 1], [], []>} : vector<24x38xf32>, vector<38x251xf32>, vector<24x251xf32> -> vector<24x251xf32>
    %7 = arith.addf %2, %6 : vector<24x251xf32>
    %c1 = arith.constant 1 : index
    %c0_6 = arith.constant 0 : index
    %c0_7 = arith.constant 0 : index
    %8 = vector.load %arg2[%c1, %c0_6, %c0_7] : memref<6x24x38xf32, #tpu.memory_space<vmem>>, vector<1x24x38xf32>
    %9 = vector.shape_cast %8 : vector<1x24x38xf32> to vector<24x38xf32>
    %10 = vector.extract_strided_slice %1 {offsets = [0, 1], sizes = [38, 251], strides = [1, 1]} : vector<38x256xf32> to vector<38x251xf32>
    %cst_8 = arith.constant dense<0.000000e+00> : vector<24x251xf32>
    %11 = tpu.matmul %9, %10, %cst_8 {dimension_numbers = #tpu.dot_dimension_numbers<[1], [0], [0], [1], [0, 0, 1, 1], [], []>} : vector<24x38xf32>, vector<38x251xf32>, vector<24x251xf32> -> vector<24x251xf32>
    %12 = arith.addf %7, %11 : vector<24x251xf32>
    %c2 = arith.constant 2 : index
    %c0_9 = arith.constant 0 : index
    %c0_10 = arith.constant 0 : index
    %13 = vector.load %arg2[%c2, %c0_9, %c0_10] : memref<6x24x38xf32, #tpu.memory_space<vmem>>, vector<1x24x38xf32>
    %14 = vector.shape_cast %13 : vector<1x24x38xf32> to vector<24x38xf32>
    %15 = vector.extract_strided_slice %1 {offsets = [0, 2], sizes = [38, 251], strides = [1, 1]} : vector<38x256xf32> to vector<38x251xf32>
    %cst_11 = arith.constant dense<0.000000e+00> : vector<24x251xf32>
    %16 = tpu.matmul %14, %15, %cst_11 {dimension_numbers = #tpu.dot_dimension_numbers<[1], [0], [0], [1], [0, 0, 1, 1], [], []>} : vector<24x38xf32>, vector<38x251xf32>, vector<24x251xf32> -> vector<24x251xf32>
    %17 = arith.addf %12, %16 : vector<24x251xf32>
    %c3 = arith.constant 3 : index
    %c0_12 = arith.constant 0 : index
    %c0_13 = arith.constant 0 : index
    %18 = vector.load %arg2[%c3, %c0_12, %c0_13] : memref<6x24x38xf32, #tpu.memory_space<vmem>>, vector<1x24x38xf32>
    %19 = vector.shape_cast %18 : vector<1x24x38xf32> to vector<24x38xf32>
    %20 = vector.extract_strided_slice %1 {offsets = [0, 3], sizes = [38, 251], strides = [1, 1]} : vector<38x256xf32> to vector<38x251xf32>
    %cst_14 = arith.constant dense<0.000000e+00> : vector<24x251xf32>
    %21 = tpu.matmul %19, %20, %cst_14 {dimension_numbers = #tpu.dot_dimension_numbers<[1], [0], [0], [1], [0, 0, 1, 1], [], []>} : vector<24x38xf32>, vector<38x251xf32>, vector<24x251xf32> -> vector<24x251xf32>
    %22 = arith.addf %17, %21 : vector<24x251xf32>
    %c4 = arith.constant 4 : index
    %c0_15 = arith.constant 0 : index
    %c0_16 = arith.constant 0 : index
    %23 = vector.load %arg2[%c4, %c0_15, %c0_16] : memref<6x24x38xf32, #tpu.memory_space<vmem>>, vector<1x24x38xf32>
    %24 = vector.shape_cast %23 : vector<1x24x38xf32> to vector<24x38xf32>
    %25 = vector.extract_strided_slice %1 {offsets = [0, 4], sizes = [38, 251], strides = [1, 1]} : vector<38x256xf32> to vector<38x251xf32>
    %cst_17 = arith.constant dense<0.000000e+00> : vector<24x251xf32>
    %26 = tpu.matmul %24, %25, %cst_17 {dimension_numbers = #tpu.dot_dimension_numbers<[1], [0], [0], [1], [0, 0, 1, 1], [], []>} : vector<24x38xf32>, vector<38x251xf32>, vector<24x251xf32> -> vector<24x251xf32>
    %27 = arith.addf %22, %26 : vector<24x251xf32>
    %c5 = arith.constant 5 : index
    %c0_18 = arith.constant 0 : index
    %c0_19 = arith.constant 0 : index
    %28 = vector.load %arg2[%c5, %c0_18, %c0_19] : memref<6x24x38xf32, #tpu.memory_space<vmem>>, vector<1x24x38xf32>
    %29 = vector.shape_cast %28 : vector<1x24x38xf32> to vector<24x38xf32>
    %30 = vector.extract_strided_slice %1 {offsets = [0, 5], sizes = [38, 251], strides = [1, 1]} : vector<38x256xf32> to vector<38x251xf32>
    %cst_20 = arith.constant dense<0.000000e+00> : vector<24x251xf32>
    %31 = tpu.matmul %29, %30, %cst_20 {dimension_numbers = #tpu.dot_dimension_numbers<[1], [0], [0], [1], [0, 0, 1, 1], [], []>} : vector<24x38xf32>, vector<38x251xf32>, vector<24x251xf32> -> vector<24x251xf32>
    %32 = arith.addf %27, %31 : vector<24x251xf32>
    %c0_21 = arith.constant 0 : index
    %c0_22 = arith.constant 0 : index
    %33 = vector.load %arg4[%c0_21, %c0_22] : memref<251x126xf32, #tpu.memory_space<vmem>>, vector<251x126xf32>
    %cst_23 = arith.constant dense<0.000000e+00> : vector<24x126xf32>
    %34 = tpu.matmul %32, %33, %cst_23 {dimension_numbers = #tpu.dot_dimension_numbers<[1], [0], [0], [1], [0, 0, 1, 1], [], []>} : vector<24x251xf32>, vector<251x126xf32>, vector<24x126xf32> -> vector<24x126xf32>
    %c0_24 = arith.constant 0 : index
    %c0_25 = arith.constant 0 : index
    %35 = vector.load %arg3[%c0_24, %c0_25] : memref<24x1xf32, #tpu.memory_space<vmem>>, vector<24x1xf32>
    %36 = vector.broadcast %35 : vector<24x1xf32> to vector<24x126xf32>
    %37 = arith.addf %34, %36 : vector<24x126xf32>
    %38 = arith.negf %37 : vector<24x126xf32>
    %39 = math.exp %38 : vector<24x126xf32>
    %cst_26 = arith.constant 1.000000e+00 : f32
    %40 = vector.broadcast %cst_26 : f32 to vector<24x126xf32>
    %41 = arith.addf %40, %39 : vector<24x126xf32>
    %42 = arith.divf %40, %41 : vector<24x126xf32>
    %cst_27 = arith.constant 0.000000e+00 : f32
    %43 = vector.broadcast %cst_27 : f32 to vector<12x121xf32>
    %c0_28 = arith.constant 0 : index
    %c0_29 = arith.constant 0 : index
    %c0_30 = arith.constant 0 : index
    %44 = vector.load %arg5[%c0_28, %c0_29, %c0_30] : memref<6x12x24xf32, #tpu.memory_space<vmem>>, vector<1x12x24xf32>
    %45 = vector.shape_cast %44 : vector<1x12x24xf32> to vector<12x24xf32>
    %46 = vector.extract_strided_slice %42 {offsets = [0, 0], sizes = [24, 121], strides = [1, 1]} : vector<24x126xf32> to vector<24x121xf32>
    %cst_31 = arith.constant dense<0.000000e+00> : vector<12x121xf32>
    %47 = tpu.matmul %45, %46, %cst_31 {dimension_numbers = #tpu.dot_dimension_numbers<[1], [0], [0], [1], [0, 0, 1, 1], [], []>} : vector<12x24xf32>, vector<24x121xf32>, vector<12x121xf32> -> vector<12x121xf32>
    %48 = arith.addf %43, %47 : vector<12x121xf32>
    %c1_32 = arith.constant 1 : index
    %c0_33 = arith.constant 0 : index
    %c0_34 = arith.constant 0 : index
    %49 = vector.load %arg5[%c1_32, %c0_33, %c0_34] : memref<6x12x24xf32, #tpu.memory_space<vmem>>, vector<1x12x24xf32>
    %50 = vector.shape_cast %49 : vector<1x12x24xf32> to vector<12x24xf32>
    %51 = vector.extract_strided_slice %42 {offsets = [0, 1], sizes = [24, 121], strides = [1, 1]} : vector<24x126xf32> to vector<24x121xf32>
    %cst_35 = arith.constant dense<0.000000e+00> : vector<12x121xf32>
    %52 = tpu.matmul %50, %51, %cst_35 {dimension_numbers = #tpu.dot_dimension_numbers<[1], [0], [0], [1], [0, 0, 1, 1], [], []>} : vector<12x24xf32>, vector<24x121xf32>, vector<12x121xf32> -> vector<12x121xf32>
    %53 = arith.addf %48, %52 : vector<12x121xf32>
    %c2_36 = arith.constant 2 : index
    %c0_37 = arith.constant 0 : index
    %c0_38 = arith.constant 0 : index
    %54 = vector.load %arg5[%c2_36, %c0_37, %c0_38] : memref<6x12x24xf32, #tpu.memory_space<vmem>>, vector<1x12x24xf32>
    %55 = vector.shape_cast %54 : vector<1x12x24xf32> to vector<12x24xf32>
    %56 = vector.extract_strided_slice %42 {offsets = [0, 2], sizes = [24, 121], strides = [1, 1]} : vector<24x126xf32> to vector<24x121xf32>
    %cst_39 = arith.constant dense<0.000000e+00> : vector<12x121xf32>
    %57 = tpu.matmul %55, %56, %cst_39 {dimension_numbers = #tpu.dot_dimension_numbers<[1], [0], [0], [1], [0, 0, 1, 1], [], []>} : vector<12x24xf32>, vector<24x121xf32>, vector<12x121xf32> -> vector<12x121xf32>
    %58 = arith.addf %53, %57 : vector<12x121xf32>
    %c3_40 = arith.constant 3 : index
    %c0_41 = arith.constant 0 : index
    %c0_42 = arith.constant 0 : index
    %59 = vector.load %arg5[%c3_40, %c0_41, %c0_42] : memref<6x12x24xf32, #tpu.memory_space<vmem>>, vector<1x12x24xf32>
    %60 = vector.shape_cast %59 : vector<1x12x24xf32> to vector<12x24xf32>
    %61 = vector.extract_strided_slice %42 {offsets = [0, 3], sizes = [24, 121], strides = [1, 1]} : vector<24x126xf32> to vector<24x121xf32>
    %cst_43 = arith.constant dense<0.000000e+00> : vector<12x121xf32>
    %62 = tpu.matmul %60, %61, %cst_43 {dimension_numbers = #tpu.dot_dimension_numbers<[1], [0], [0], [1], [0, 0, 1, 1], [], []>} : vector<12x24xf32>, vector<24x121xf32>, vector<12x121xf32> -> vector<12x121xf32>
    %63 = arith.addf %58, %62 : vector<12x121xf32>
    %c4_44 = arith.constant 4 : index
    %c0_45 = arith.constant 0 : index
    %c0_46 = arith.constant 0 : index
    %64 = vector.load %arg5[%c4_44, %c0_45, %c0_46] : memref<6x12x24xf32, #tpu.memory_space<vmem>>, vector<1x12x24xf32>
    %65 = vector.shape_cast %64 : vector<1x12x24xf32> to vector<12x24xf32>
    %66 = vector.extract_strided_slice %42 {offsets = [0, 4], sizes = [24, 121], strides = [1, 1]} : vector<24x126xf32> to vector<24x121xf32>
    %cst_47 = arith.constant dense<0.000000e+00> : vector<12x121xf32>
    %67 = tpu.matmul %65, %66, %cst_47 {dimension_numbers = #tpu.dot_dimension_numbers<[1], [0], [0], [1], [0, 0, 1, 1], [], []>} : vector<12x24xf32>, vector<24x121xf32>, vector<12x121xf32> -> vector<12x121xf32>
    %68 = arith.addf %63, %67 : vector<12x121xf32>
    %c5_48 = arith.constant 5 : index
    %c0_49 = arith.constant 0 : index
    %c0_50 = arith.constant 0 : index
    %69 = vector.load %arg5[%c5_48, %c0_49, %c0_50] : memref<6x12x24xf32, #tpu.memory_space<vmem>>, vector<1x12x24xf32>
    %70 = vector.shape_cast %69 : vector<1x12x24xf32> to vector<12x24xf32>
    %71 = vector.extract_strided_slice %42 {offsets = [0, 5], sizes = [24, 121], strides = [1, 1]} : vector<24x126xf32> to vector<24x121xf32>
    %cst_51 = arith.constant dense<0.000000e+00> : vector<12x121xf32>
    %72 = tpu.matmul %70, %71, %cst_51 {dimension_numbers = #tpu.dot_dimension_numbers<[1], [0], [0], [1], [0, 0, 1, 1], [], []>} : vector<12x24xf32>, vector<24x121xf32>, vector<12x121xf32> -> vector<12x121xf32>
    %73 = arith.addf %68, %72 : vector<12x121xf32>
    %c0_52 = arith.constant 0 : index
    %c0_53 = arith.constant 0 : index
    %74 = vector.load %arg7[%c0_52, %c0_53] : memref<121x25xf32, #tpu.memory_space<vmem>>, vector<121x25xf32>
    %cst_54 = arith.constant dense<0.000000e+00> : vector<12x25xf32>
    %75 = tpu.matmul %73, %74, %cst_54 {dimension_numbers = #tpu.dot_dimension_numbers<[1], [0], [0], [1], [0, 0, 1, 1], [], []>} : vector<12x121xf32>, vector<121x25xf32>, vector<12x25xf32> -> vector<12x25xf32>
    %c0_55 = arith.constant 0 : index
    %c0_56 = arith.constant 0 : index
    %76 = vector.load %arg6[%c0_55, %c0_56] : memref<12x1xf32, #tpu.memory_space<vmem>>, vector<12x1xf32>
    %77 = vector.broadcast %76 : vector<12x1xf32> to vector<12x25xf32>
    %78 = arith.addf %75, %77 : vector<12x25xf32>
    %79 = arith.negf %78 : vector<12x25xf32>
    %80 = math.exp %79 : vector<12x25xf32>
    %cst_57 = arith.constant 1.000000e+00 : f32
    %81 = vector.broadcast %cst_57 : f32 to vector<12x25xf32>
    %82 = arith.addf %81, %80 : vector<12x25xf32>
    %83 = arith.divf %81, %82 : vector<12x25xf32>
    %cst_58 = arith.constant 0.000000e+00 : f32
    %84 = vector.broadcast %cst_58 : f32 to vector<1x14xf32>
    %c0_59 = arith.constant 0 : index
    %c0_60 = arith.constant 0 : index
    %c0_61 = arith.constant 0 : index
    %85 = vector.load %arg8[%c0_59, %c0_60, %c0_61] : memref<12x1x12xf32, #tpu.memory_space<vmem>>, vector<1x1x12xf32>
    %86 = vector.shape_cast %85 : vector<1x1x12xf32> to vector<1x12xf32>
    %87 = vector.extract_strided_slice %83 {offsets = [0, 0], sizes = [12, 14], strides = [1, 1]} : vector<12x25xf32> to vector<12x14xf32>
    %cst_62 = arith.constant dense<0.000000e+00> : vector<1x14xf32>
    %88 = tpu.matmul %86, %87, %cst_62 {dimension_numbers = #tpu.dot_dimension_numbers<[1], [0], [0], [1], [0, 0, 1, 1], [], []>} : vector<1x12xf32>, vector<12x14xf32>, vector<1x14xf32> -> vector<1x14xf32>
    %89 = arith.addf %84, %88 : vector<1x14xf32>
    %c1_63 = arith.constant 1 : index
    %c0_64 = arith.constant 0 : index
    %c0_65 = arith.constant 0 : index
    %90 = vector.load %arg8[%c1_63, %c0_64, %c0_65] : memref<12x1x12xf32, #tpu.memory_space<vmem>>, vector<1x1x12xf32>
    %91 = vector.shape_cast %90 : vector<1x1x12xf32> to vector<1x12xf32>
    %92 = vector.extract_strided_slice %83 {offsets = [0, 1], sizes = [12, 14], strides = [1, 1]} : vector<12x25xf32> to vector<12x14xf32>
    %cst_66 = arith.constant dense<0.000000e+00> : vector<1x14xf32>
    %93 = tpu.matmul %91, %92, %cst_66 {dimension_numbers = #tpu.dot_dimension_numbers<[1], [0], [0], [1], [0, 0, 1, 1], [], []>} : vector<1x12xf32>, vector<12x14xf32>, vector<1x14xf32> -> vector<1x14xf32>
    %94 = arith.addf %89, %93 : vector<1x14xf32>
    %c2_67 = arith.constant 2 : index
    %c0_68 = arith.constant 0 : index
    %c0_69 = arith.constant 0 : index
    %95 = vector.load %arg8[%c2_67, %c0_68, %c0_69] : memref<12x1x12xf32, #tpu.memory_space<vmem>>, vector<1x1x12xf32>
    %96 = vector.shape_cast %95 : vector<1x1x12xf32> to vector<1x12xf32>
    %97 = vector.extract_strided_slice %83 {offsets = [0, 2], sizes = [12, 14], strides = [1, 1]} : vector<12x25xf32> to vector<12x14xf32>
    %cst_70 = arith.constant dense<0.000000e+00> : vector<1x14xf32>
    %98 = tpu.matmul %96, %97, %cst_70 {dimension_numbers = #tpu.dot_dimension_numbers<[1], [0], [0], [1], [0, 0, 1, 1], [], []>} : vector<1x12xf32>, vector<12x14xf32>, vector<1x14xf32> -> vector<1x14xf32>
    %99 = arith.addf %94, %98 : vector<1x14xf32>
    %c3_71 = arith.constant 3 : index
    %c0_72 = arith.constant 0 : index
    %c0_73 = arith.constant 0 : index
    %100 = vector.load %arg8[%c3_71, %c0_72, %c0_73] : memref<12x1x12xf32, #tpu.memory_space<vmem>>, vector<1x1x12xf32>
    %101 = vector.shape_cast %100 : vector<1x1x12xf32> to vector<1x12xf32>
    %102 = vector.extract_strided_slice %83 {offsets = [0, 3], sizes = [12, 14], strides = [1, 1]} : vector<12x25xf32> to vector<12x14xf32>
    %cst_74 = arith.constant dense<0.000000e+00> : vector<1x14xf32>
    %103 = tpu.matmul %101, %102, %cst_74 {dimension_numbers = #tpu.dot_dimension_numbers<[1], [0], [0], [1], [0, 0, 1, 1], [], []>} : vector<1x12xf32>, vector<12x14xf32>, vector<1x14xf32> -> vector<1x14xf32>
    %104 = arith.addf %99, %103 : vector<1x14xf32>
    %c4_75 = arith.constant 4 : index
    %c0_76 = arith.constant 0 : index
    %c0_77 = arith.constant 0 : index
    %105 = vector.load %arg8[%c4_75, %c0_76, %c0_77] : memref<12x1x12xf32, #tpu.memory_space<vmem>>, vector<1x1x12xf32>
    %106 = vector.shape_cast %105 : vector<1x1x12xf32> to vector<1x12xf32>
    %107 = vector.extract_strided_slice %83 {offsets = [0, 4], sizes = [12, 14], strides = [1, 1]} : vector<12x25xf32> to vector<12x14xf32>
    %cst_78 = arith.constant dense<0.000000e+00> : vector<1x14xf32>
    %108 = tpu.matmul %106, %107, %cst_78 {dimension_numbers = #tpu.dot_dimension_numbers<[1], [0], [0], [1], [0, 0, 1, 1], [], []>} : vector<1x12xf32>, vector<12x14xf32>, vector<1x14xf32> -> vector<1x14xf32>
    %109 = arith.addf %104, %108 : vector<1x14xf32>
    %c5_79 = arith.constant 5 : index
    %c0_80 = arith.constant 0 : index
    %c0_81 = arith.constant 0 : index
    %110 = vector.load %arg8[%c5_79, %c0_80, %c0_81] : memref<12x1x12xf32, #tpu.memory_space<vmem>>, vector<1x1x12xf32>
    %111 = vector.shape_cast %110 : vector<1x1x12xf32> to vector<1x12xf32>
    %112 = vector.extract_strided_slice %83 {offsets = [0, 5], sizes = [12, 14], strides = [1, 1]} : vector<12x25xf32> to vector<12x14xf32>
    %cst_82 = arith.constant dense<0.000000e+00> : vector<1x14xf32>
    %113 = tpu.matmul %111, %112, %cst_82 {dimension_numbers = #tpu.dot_dimension_numbers<[1], [0], [0], [1], [0, 0, 1, 1], [], []>} : vector<1x12xf32>, vector<12x14xf32>, vector<1x14xf32> -> vector<1x14xf32>
    %114 = arith.addf %109, %113 : vector<1x14xf32>
    %c6 = arith.constant 6 : index
    %c0_83 = arith.constant 0 : index
    %c0_84 = arith.constant 0 : index
    %115 = vector.load %arg8[%c6, %c0_83, %c0_84] : memref<12x1x12xf32, #tpu.memory_space<vmem>>, vector<1x1x12xf32>
    %116 = vector.shape_cast %115 : vector<1x1x12xf32> to vector<1x12xf32>
    %117 = vector.extract_strided_slice %83 {offsets = [0, 6], sizes = [12, 14], strides = [1, 1]} : vector<12x25xf32> to vector<12x14xf32>
    %cst_85 = arith.constant dense<0.000000e+00> : vector<1x14xf32>
    %118 = tpu.matmul %116, %117, %cst_85 {dimension_numbers = #tpu.dot_dimension_numbers<[1], [0], [0], [1], [0, 0, 1, 1], [], []>} : vector<1x12xf32>, vector<12x14xf32>, vector<1x14xf32> -> vector<1x14xf32>
    %119 = arith.addf %114, %118 : vector<1x14xf32>
    %c7 = arith.constant 7 : index
    %c0_86 = arith.constant 0 : index
    %c0_87 = arith.constant 0 : index
    %120 = vector.load %arg8[%c7, %c0_86, %c0_87] : memref<12x1x12xf32, #tpu.memory_space<vmem>>, vector<1x1x12xf32>
    %121 = vector.shape_cast %120 : vector<1x1x12xf32> to vector<1x12xf32>
    %122 = vector.extract_strided_slice %83 {offsets = [0, 7], sizes = [12, 14], strides = [1, 1]} : vector<12x25xf32> to vector<12x14xf32>
    %cst_88 = arith.constant dense<0.000000e+00> : vector<1x14xf32>
    %123 = tpu.matmul %121, %122, %cst_88 {dimension_numbers = #tpu.dot_dimension_numbers<[1], [0], [0], [1], [0, 0, 1, 1], [], []>} : vector<1x12xf32>, vector<12x14xf32>, vector<1x14xf32> -> vector<1x14xf32>
    %124 = arith.addf %119, %123 : vector<1x14xf32>
    %c8 = arith.constant 8 : index
    %c0_89 = arith.constant 0 : index
    %c0_90 = arith.constant 0 : index
    %125 = vector.load %arg8[%c8, %c0_89, %c0_90] : memref<12x1x12xf32, #tpu.memory_space<vmem>>, vector<1x1x12xf32>
    %126 = vector.shape_cast %125 : vector<1x1x12xf32> to vector<1x12xf32>
    %127 = vector.extract_strided_slice %83 {offsets = [0, 8], sizes = [12, 14], strides = [1, 1]} : vector<12x25xf32> to vector<12x14xf32>
    %cst_91 = arith.constant dense<0.000000e+00> : vector<1x14xf32>
    %128 = tpu.matmul %126, %127, %cst_91 {dimension_numbers = #tpu.dot_dimension_numbers<[1], [0], [0], [1], [0, 0, 1, 1], [], []>} : vector<1x12xf32>, vector<12x14xf32>, vector<1x14xf32> -> vector<1x14xf32>
    %129 = arith.addf %124, %128 : vector<1x14xf32>
    %c9 = arith.constant 9 : index
    %c0_92 = arith.constant 0 : index
    %c0_93 = arith.constant 0 : index
    %130 = vector.load %arg8[%c9, %c0_92, %c0_93] : memref<12x1x12xf32, #tpu.memory_space<vmem>>, vector<1x1x12xf32>
    %131 = vector.shape_cast %130 : vector<1x1x12xf32> to vector<1x12xf32>
    %132 = vector.extract_strided_slice %83 {offsets = [0, 9], sizes = [12, 14], strides = [1, 1]} : vector<12x25xf32> to vector<12x14xf32>
    %cst_94 = arith.constant dense<0.000000e+00> : vector<1x14xf32>
    %133 = tpu.matmul %131, %132, %cst_94 {dimension_numbers = #tpu.dot_dimension_numbers<[1], [0], [0], [1], [0, 0, 1, 1], [], []>} : vector<1x12xf32>, vector<12x14xf32>, vector<1x14xf32> -> vector<1x14xf32>
    %134 = arith.addf %129, %133 : vector<1x14xf32>
    %c10 = arith.constant 10 : index
    %c0_95 = arith.constant 0 : index
    %c0_96 = arith.constant 0 : index
    %135 = vector.load %arg8[%c10, %c0_95, %c0_96] : memref<12x1x12xf32, #tpu.memory_space<vmem>>, vector<1x1x12xf32>
    %136 = vector.shape_cast %135 : vector<1x1x12xf32> to vector<1x12xf32>
    %137 = vector.extract_strided_slice %83 {offsets = [0, 10], sizes = [12, 14], strides = [1, 1]} : vector<12x25xf32> to vector<12x14xf32>
    %cst_97 = arith.constant dense<0.000000e+00> : vector<1x14xf32>
    %138 = tpu.matmul %136, %137, %cst_97 {dimension_numbers = #tpu.dot_dimension_numbers<[1], [0], [0], [1], [0, 0, 1, 1], [], []>} : vector<1x12xf32>, vector<12x14xf32>, vector<1x14xf32> -> vector<1x14xf32>
    %139 = arith.addf %134, %138 : vector<1x14xf32>
    %c11 = arith.constant 11 : index
    %c0_98 = arith.constant 0 : index
    %c0_99 = arith.constant 0 : index
    %140 = vector.load %arg8[%c11, %c0_98, %c0_99] : memref<12x1x12xf32, #tpu.memory_space<vmem>>, vector<1x1x12xf32>
    %141 = vector.shape_cast %140 : vector<1x1x12xf32> to vector<1x12xf32>
    %142 = vector.extract_strided_slice %83 {offsets = [0, 11], sizes = [12, 14], strides = [1, 1]} : vector<12x25xf32> to vector<12x14xf32>
    %cst_100 = arith.constant dense<0.000000e+00> : vector<1x14xf32>
    %143 = tpu.matmul %141, %142, %cst_100 {dimension_numbers = #tpu.dot_dimension_numbers<[1], [0], [0], [1], [0, 0, 1, 1], [], []>} : vector<1x12xf32>, vector<12x14xf32>, vector<1x14xf32> -> vector<1x14xf32>
    %144 = arith.addf %139, %143 : vector<1x14xf32>
    %c0_101 = arith.constant 0 : index
    %c0_102 = arith.constant 0 : index
    %145 = vector.load %arg9[%c0_101, %c0_102] : memref<1x1xf32, #tpu.memory_space<vmem>>, vector<1x1xf32>
    %146 = vector.broadcast %145 : vector<1x1xf32> to vector<1x14xf32>
    %147 = arith.addf %144, %146 : vector<1x14xf32>
    %148 = arith.negf %147 : vector<1x14xf32>
    %149 = math.exp %148 : vector<1x14xf32>
    %cst_103 = arith.constant 1.000000e+00 : f32
    %150 = vector.broadcast %cst_103 : f32 to vector<1x14xf32>
    %151 = arith.addf %150, %149 : vector<1x14xf32>
    %152 = arith.divf %150, %151 : vector<1x14xf32>
    %c0_104 = arith.constant 0 : index
    %c0_105 = arith.constant 0 : index
    %c0_106 = arith.constant 0 : index
    %153 = vector.load %arg10[%c0_104, %c0_105, %c0_106] : memref<1x1x14xf32, #tpu.memory_space<vmem>>, vector<1x1x14xf32>
    %154 = vector.shape_cast %153 : vector<1x1x14xf32> to vector<1x14xf32>
    %155 = vector.shape_cast %152 : vector<1x14xf32> to vector<1x1x14xf32>
    tpu.vector_store %arg10[%c0_104, %c0_105, %c0_106], %155 {strides = array<i32>} : memref<1x1x14xf32, #tpu.memory_space<vmem>>, vector<1x1x14xf32>,
    return
  }
  func.func @transform_0(%arg0: i32) -> (i32, i32, i32) {
    %c0_i32 = arith.constant 0 : i32
    %c0_i32_0 = arith.constant 0 : i32
    %c0_i32_1 = arith.constant 0 : i32
    return %arg0, %c0_i32, %c0_i32_0 : i32, i32, i32
  }
  func.func @transform_1(%arg0: i32) -> (i32, i32, i32) {
    %c0_i32 = arith.constant 0 : i32
    %c0_i32_0 = arith.constant 0 : i32
    %c0_i32_1 = arith.constant 0 : i32
    %c0_i32_2 = arith.constant 0 : i32
    return %c0_i32, %c0_i32_0, %c0_i32_1 : i32, i32, i32
  }
  func.func @transform_2(%arg0: i32) -> (i32, i32) {
    %c0_i32 = arith.constant 0 : i32
    %c0_i32_0 = arith.constant 0 : i32
    %c0_i32_1 = arith.constant 0 : i32
    return %c0_i32, %c0_i32_0 : i32, i32
  }
  func.func @transform_3(%arg0: i32) -> (i32, i32) {
    %c0_i32 = arith.constant 0 : i32
    %c0_i32_0 = arith.constant 0 : i32
    %c0_i32_1 = arith.constant 0 : i32
    return %c0_i32, %c0_i32_0 : i32, i32
  }
  func.func @transform_4(%arg0: i32) -> (i32, i32, i32) {
    %c0_i32 = arith.constant 0 : i32
    %c0_i32_0 = arith.constant 0 : i32
    %c0_i32_1 = arith.constant 0 : i32
    %c0_i32_2 = arith.constant 0 : i32
    return %c0_i32, %c0_i32_0, %c0_i32_1 : i32, i32, i32
  }
  func.func @transform_5(%arg0: i32) -> (i32, i32) {
    %c0_i32 = arith.constant 0 : i32
    %c0_i32_0 = arith.constant 0 : i32
    %c0_i32_1 = arith.constant 0 : i32
    return %c0_i32, %c0_i32_0 : i32, i32
  }
  func.func @transform_6(%arg0: i32) -> (i32, i32) {
    %c0_i32 = arith.constant 0 : i32
    %c0_i32_0 = arith.constant 0 : i32
    %c0_i32_1 = arith.constant 0 : i32
    return %c0_i32, %c0_i32_0 : i32, i32
  }
  func.func @transform_7(%arg0: i32) -> (i32, i32, i32) {
    %c0_i32 = arith.constant 0 : i32
    %c0_i32_0 = arith.constant 0 : i32
    %c0_i32_1 = arith.constant 0 : i32
    %c0_i32_2 = arith.constant 0 : i32
    return %c0_i32, %c0_i32_0, %c0_i32_1 : i32, i32, i32
  }
  func.func @transform_8(%arg0: i32) -> (i32, i32) {
    %c0_i32 = arith.constant 0 : i32
    %c0_i32_0 = arith.constant 0 : i32
    %c0_i32_1 = arith.constant 0 : i32
    return %c0_i32, %c0_i32_0 : i32, i32
  }
  func.func @transform_9(%arg0: i32) -> (i32, i32, i32) {
    %c0_i32 = arith.constant 0 : i32
    %c0_i32_0 = arith.constant 0 : i32
    %c0_i32_1 = arith.constant 0 : i32
    return %arg0, %c0_i32, %c0_i32_0 : i32, i32, i32
  }
}

</mosaic_0001>

<bundles_post_ra>
// kernel: decoder_forward_pallas.1
= control target key start
LH: loop header
LB: loop body
LE: loop exit
PB: predicated region body
PF: predicated region fallthrough
CT: control target
= control target key end

     0   :  { %s3025_s0 = inlined_call_operand.vmem [shape: f32[2,38,256], index: 0, kind: input, shape index: {}]   ;;  %s3026_s1 = inlined_call_operand.vmem [shape: f32[6,24,38], index: 1, kind: input, shape index: {}]   ;;  %s3027_s2 = inlined_call_operand.vmem [shape: f32[24,1], index: 2, kind: input, shape index: {}]   ;;  %s3028_s3 = inlined_call_operand.vmem [shape: f32[251,126], index: 3, kind: input, shape index: {}]   ;;  %s3029_s4 = inlined_call_operand.vmem [shape: f32[6,12,24], index: 4, kind: input, shape index: {}]   ;;  %s3030_s5 = inlined_call_operand.vmem [shape: f32[12,1], index: 5, kind: input, shape index: {}]   ;;  %s3031_s6 = inlined_call_operand.vmem [shape: f32[121,25], index: 6, kind: input, shape index: {}]   ;;  %s3032_s7 = inlined_call_operand.vmem [shape: f32[12,1,12], index: 7, kind: input, shape index: {}]   ;;  %s3033_s8 = inlined_call_operand.<no memory space> [shape: f32[1,1], index: 8, kind: input, shape index: {}]   ;;  %s3034_s9 = inlined_call_operand.hbm [shape: f32[2,1,14], index: 9, kind: output, shape index: {}]  }
   0x1   :  { %v14_v0 = vstv %s3033_s8 }
   0x2   :  { %15 = vst [vmem:[#allocation2] sm:$0x1] %v14_v0 }
   0x3   :  { %16 = vsyncpa [#allocation4], 0 }
   0x4   :  { %18 = vsyncpa [#allocation4 + $0x1], 0  ;;  %s2443_s11 = smov 0   ;;  %s2445_s12 = smov 0  }
   0x5   :  { %s2447_s13 = smov 0   ;;  %s2449_s14 = smov 0  }
   0x6 LB: > { %s2464_s8 = sadd.s32 4294967295, %s2376_s14   ;;  %s1970_s15 = sadd.s32 4294967294, %s2376_s14   ;;  %s2376_s14 = sphi %s2449_s14, %s3052_s14   ;;  %s2372_s13 = sphi %s2447_s13, %s3051_s13   ;;  %s2368_s12 = sphi %s2445_s12, %s3050_s12   ;;  %s2364_s11 = sphi %s2443_s11, %s3049_s11  }
   0x7   : > { %s2468_s16 = sadd.s32 1, %s2376_s14   ;;  %s225_s17 = sadd.s32 1, %s2372_s13 }
   0x8   : > { %s222_s18 = ssub.s32 %s2376_s14, %s2468_s16  ;;  %p235_p0 = scmp.ne.s32.totalorder %s2372_s13, %s2368_s12 }
   0x9   : > { %p223_p1 = scmp.eq.s32.totalorder %s222_s18, 0  ;;  %p236_p2 = scmp.eq.s32.totalorder %s2464_s8, 1 }
   0xa   : > { %p241_p3 = scmp.ne.s32.totalorder %s2368_s12, %s2364_s11  ;;  %p242_p4 = scmp.eq.s32.totalorder %s1970_s15, 1 }
   0xb   : > { %s2479_s19 = scalar_select %p223_p1, %s2372_s13, %s225_s17  }
   0xc   : > { %p2481_p5 = por %p236_p2, %p235_p0  ;;  %p2485_p6 = por %p242_p4, %p241_p3 }
   0xd   : > { %p1973_p7 = scmp.ge.s32.totalorder %s2376_s14, 1  ;;  %p292_p8 = scmp.lt.s32.totalorder %s2376_s14, 3 }
   0xf   : > { %p293_p9 = pnand %p1973_p7, %p292_p8 }
  0x10   : > { %p327_p10 = scmp.lt.s32.totalorder (!%p293_p9), %s2464_s8, 1  ;;  %s2378_s27 = smov (!%p293_p9), 127  }
  0x11   : > { %296 = sbr.rel (%p293_p9) target bundleno = 1308 (0x51c), region = 56  ;;  %s3037_s28 = smov (!%p293_p9), 125  }
  0x12   : > { %s3041_s29 = smov (!%p293_p9), 126   ;;  %s3039_s30 = smov (!%p293_p9), 123  }
  0x13   : > { %s3035_s10 = smov (!%p293_p9), 124   ;;  %s3045_s15 = smov (!%p293_p9), 125  }
  0x14   : > { %s3046_s17 = smov (!%p293_p9), 124   ;;  %s3047_s25 = smov (!%p293_p9), 126  }
  0x15   : > { %s1911_s18 = scalar_lea.hbm (!%p293_p9), %s3034_s9, %s2464_s8 }
  0x16   : > { %s328_s22 = scalar_select %p327_p10, %s2464_s8, 1  ;;  %vm403_vm0 = vcmask 1045504   ;;  %v342_v16 = vld [vmem:[%s3026_s1] sm:$0xff]  ;;  %vm393_vm1 = vcmask 310272   ;;  %v343_v18 = vld [vmem:[%s3026_s1 + $0x8] sm:$0xff]  ;;  %v344_v22 = vld [vmem:[%s3026_s1 + $0x10] sm:$0xff] }
  0x17   : > { %vm379_vm2 = vcmask 1039360   ;;  %v1975_v40 = vld [vmem:[%s3026_s1 + $0x18] sm:$0xff]  ;;  %vm658_vm3 = vcmask 1022976   ;;  %v1976_v50 = vld [vmem:[%s3026_s1 + $0x20] sm:$0xff]  ;;  %vm549_vm4 = vcmask 1031168   ;;  %v1977_v57 = vld [vmem:[%s3026_s1 + $0x28] sm:$0xff] }
  0x18   : > { %s2110_s23 = smul.u32 80, %s328_s22  ;;  %vm876_vm5 = vcmask 1006592   ;;  %vm767_vm6 = vcmask 1014784   ;;  %vm1020_vm7 = vcmask 1042432   ;;  %s1915_s24 = sshll.u32 %s1911_s18, 4  ;;  %s1916_s24 = int_to_ptr.hbm [resolvable:$true] %s1915_s24 }
  0x1a   : > { %s331_s26 = scalar_lea.vmem %s3025_s0, %s2110_s23 }
  0x1b   : > { %v340_v1 = vld [vmem:[%s331_s26 + $0x40] sm:$0x3f]  ;;  %v338_v2 = vld [vmem:[%s331_s26 + $0x30] sm:$0xff]  ;;  %v339_v3 = vld [vmem:[%s331_s26 + $0x38] sm:$0xff] }
  0x1c   : > { %375 = vrot.lane.b32.xlu0 %v340_v1, %s2378_s27  ;;  %v2162_v4 = vpack.i.bf16 %v339_v3, %v338_v2  ;;  %v334_v5 = vld [vmem:[%s331_s26 + $0x10] sm:$0xff]  ;;  %v335_v6 = vld [vmem:[%s331_s26 + $0x18] sm:$0xff]  ;;  %v336_v8 = vld [vmem:[%s331_s26 + $0x20] sm:$0xff]  ;;  %1986 = vmatpush.msk.msra.mxu2 %vm403_vm0, %v340_v1 }
  0x1d   : > { %v2172_v7 = vpack.i.bf16 %v335_v6, %v334_v5  ;;  %v337_v9 = vld [vmem:[%s331_s26 + $0x28] sm:$0xff]  ;;  %v332_v11 = vld [vmem:[%s331_s26] sm:$0xff] }
  0x1e   : > { %2163 = vrot.lane.b32.xlu1 %v2162_v4, %s2378_s27  ;;  %v341_v10 = vld [vmem:[%s331_s26 + $0x48] sm:$0x3f]  ;;  %v2167_v13 = vpack.i.bf16 %v337_v9, %v336_v8  ;;  %485 = vmatpush.msra.mxu2 %v338_v2 }
  0x1f   : > { %2173 = vrot.lane.b32.xlu2 %v2172_v7, %s2378_s27  ;;  %v333_v12 = vld [vmem:[%s331_s26 + $0x8] sm:$0xff]  ;;  %1990 = vmatpush.msk.msra.mxu3 %vm403_vm0, %v341_v10  ;;  %s2384_s26 = smov 121  }
  0x20   : > { %v2177_v14 = vpack.i.bf16 %v333_v12, %v332_v11  ;;  %486 = vmatpush.msra.mxu2 %v336_v8  ;;  %v2005_v8 = vld [vmem:[%s3026_s1 + $0x48] sm:$0xff] }
  0x21   : > { %511 = vmatpush.msra.mxu3 %v339_v3 }
  0x22   : > { %487 = vmatpush.msra.mxu2 %v334_v5 }
  0x23   : > { %512 = vmatpush.msra.mxu3 %v337_v9 }
  0x24   : > { %377 = vrot.lane.b32.xlu0 %v341_v10, %s2378_s27  ;;  %488 = vmatpush.msra.mxu2 %v332_v11 }
  0x25   : > { %513 = vmatpush.msra.mxu3 %v335_v6  ;;  %1987 = vmatmul.msk.f32.vlgmr.msra.gmra.mxu2 %vm393_vm1, %v342_v16 }
  0x26   : > { %2168 = vrot.lane.b32.xlu1 %v2167_v13, %s2378_s27 }
  0x27   : > { %2178 = vrot.lane.b32.xlu2 %v2177_v14, %s2378_s27  ;;  %514 = vmatpush.msra.mxu3 %v333_v12 }
  0x28   : > { %1991 = vmatmul.msk.f32.vlgmr.msra.gmra.mxu3 %vm393_vm1, %v342_v16  ;;  %v1994_v16 = vld [vmem:[%s3026_s1 + $0x30] sm:$0xff] }
  0x2c   : > { %654 = vrot.lane.b32.xlu0 %v340_v1, %s3037_s28 }
  0x2d   : > { %1988 = vmatmul.msk.f32.gmra.mxu2 %vm393_vm1, %v343_v18 }
  0x2e   : > { %656 = vrot.lane.b32.xlu1 %v341_v10, %s3037_s28 }
  0x2f   : > { %2183 = vrot.lane.b32.xlu2 %v2162_v4, %s3037_s28 }
  0x30   : > { %1992 = vmatmul.msk.f32.gmra.mxu3 %vm393_vm1, %v343_v18 }
  0x34   : > { %545 = vrot.lane.b32.xlu0 %v340_v1, %s3041_s29 }
  0x35   : > { %1989 = vmatmul.msk.f32.gmra.mxu2 %vm393_vm1, %v344_v22 }
  0x36   : > { %547 = vrot.lane.b32.xlu1 %v341_v10, %s3041_s29 }
  0x37   : > { %2188 = vrot.lane.b32.xlu2 %v2167_v13, %s3037_s28 }
  0x38   : > { %1993 = vmatmul.msk.f32.gmra.mxu3 %vm393_vm1, %v344_v22 }
  0x3c   : > { %2193 = vrot.lane.b32.xlu0 %v2162_v4, %s3041_s29 }
  0x3e   : > { %2198 = vrot.lane.b32.xlu1 %v2172_v7, %s3037_s28 }
  0x3f   : > { %2203 = vrot.lane.b32.xlu2 %v2167_v13, %s3041_s29 }
  0x44   : > { %2208 = vrot.lane.b32.xlu0 %v2177_v14, %s3037_s28  ;;  %s2386_s28 = smov 122  }
  0x46   : > { %2213 = vrot.lane.b32.xlu1 %v2172_v7, %s3041_s29 }
  0x47   : > { %2218 = vrot.lane.b32.xlu2 %v2177_v14, %s3041_s29 }
  0x4c   : > { %872 = vrot.lane.b32.xlu0 %v340_v1, %s3039_s30 }
  0x4e   : > { %874 = vrot.lane.b32.xlu1 %v341_v10, %s3039_s30 }
  0x4f   : > { %2223 = vrot.lane.b32.xlu2 %v2162_v4, %s3039_s30 }
  0x54   : > { %763 = vrot.lane.b32.xlu0 %v340_v1, %s3035_s10 }
  0x56   : > { %765 = vrot.lane.b32.xlu1 %v341_v10, %s3035_s10 }
  0x57   : > { %2228 = vrot.lane.b32.xlu2 %v2167_v13, %s3039_s30 }
  0x5c   : > { %2233 = vrot.lane.b32.xlu0 %v2162_v4, %s3035_s10 }
  0x5e   : > { %2238 = vrot.lane.b32.xlu1 %v2172_v7, %s3039_s30 }
  0x5f   : > { %2243 = vrot.lane.b32.xlu2 %v2167_v13, %s3035_s10 }
  0x64   : > { %2248 = vrot.lane.b32.xlu0 %v2177_v14, %s3039_s30 }
  0x66   : > { %2253 = vrot.lane.b32.xlu1 %v2172_v7, %s3035_s10 }
  0x67   : > { %2258 = vrot.lane.b32.xlu2 %v2177_v14, %s3035_s10  ;;  %s2387_s10 = smov 118  }
  0x79   : > { %v2174_v15 = vpop.permute.xlu2 %2173 }
  0x7a   : > { %v2175_v28 = vunpack.i.l.bf16 %v2174_v15  ;;  %v2176_v33 = vunpack.i.h.bf16 %v2174_v15 }
  0x7c   : > { %v381_v37 = vsel %vm379_vm2, %v2175_v28, %v2176_v33 }
  0x81   : > { %v2179_v17 = vpop.permute.xlu2 %2178 }
  0x82   : > { %v2180_v34 = vunpack.i.l.bf16 %v2179_v17  ;;  %v2181_v36 = vunpack.i.h.bf16 %v2179_v17 }
  0x84   : > { %v380_v43 = vsel %vm379_vm2, %v2180_v34, %v2181_v36  ;;  %v1996_v34 = vld [vmem:[%s3026_s1 + $0x40] sm:$0xff] }
  0x89   : > { %v2184_v19 = vpop.permute.xlu2 %2183 }
  0x8a   : > { %v2185_v38 = vunpack.i.l.bf16 %v2184_v19  ;;  %v2186_v39 = vunpack.i.h.bf16 %v2184_v19 }
  0x8c   : > { %v662_v48 = vsel %vm658_vm3, %v2185_v38, %v2186_v39 }
  0x8e   : > { %v376_v20 = vpop.permute.xlu0 %375 }
  0x90   : > { %v2164_v21 = vpop.permute.xlu1 %2163 }
  0x91   : > { %v2189_v23 = vpop.permute.xlu2 %2188  ;;  %v2165_v24 = vunpack.i.l.bf16 %v2164_v21  ;;  %v2166_v25 = vunpack.i.h.bf16 %v2164_v21  ;;  %v2006_v21 = vld [vmem:[%s3026_s1 + $0x50] sm:$0xff] }
  0x92   : > { %v2190_v44 = vunpack.i.l.bf16 %v2189_v23  ;;  %v2191_v45 = vunpack.i.h.bf16 %v2189_v23 }
  0x93   : > { %v383_v31 = vsel %vm379_vm2, %v2165_v24, %v2166_v25 }
  0x94   : > { %v661_v49 = vsel %vm658_vm3, %v2190_v44, %v2191_v45 }
  0x96   : > { %v378_v26 = vpop.permute.xlu0 %377 }
  0x97   : > { %1982 = vmatpush.msk.msra.mxu1 %vm403_vm0, %v378_v26  ;;  %v384_v27 = vsel %vm379_vm2, %v376_v20, %v378_v26 }
  0x98   : > { %1978 = vmatpush.msk.msra.mxu0 %vm403_vm0, %v384_v27  ;;  %v2169_v29 = vpop.permute.xlu1 %2168  ;;  %v1995_v27 = vld [vmem:[%s3026_s1 + $0x38] sm:$0xff] }
  0x99   : > { %v2170_v30 = vunpack.i.l.bf16 %v2169_v29  ;;  %446 = vmatpush.msra.mxu1 %v2166_v25  ;;  %v2171_v32 = vunpack.i.h.bf16 %v2169_v29  ;;  %v2204_v42 = vpop.permute.xlu2 %2203 }
  0x9a   : > { %420 = vmatpush.msra.mxu0 %v383_v31  ;;  %v2205_v55 = vunpack.i.l.bf16 %v2204_v42  ;;  %v2206_v56 = vunpack.i.h.bf16 %v2204_v42 }
  0x9b   : > { %447 = vmatpush.msra.mxu1 %v2171_v32  ;;  %v382_v35 = vsel %vm379_vm2, %v2170_v30, %v2171_v32  ;;  %v2007_v30 = vld [vmem:[%s3026_s1 + $0x58] sm:$0xff] }
  0x9c   : > { %421 = vmatpush.msra.mxu0 %v382_v35  ;;  %v552_v1 = vsel %vm549_vm4, %v2205_v55, %v2206_v56 }
  0x9d   : > { %448 = vmatpush.msra.mxu1 %v2176_v33 }
  0x9e   : > { %v655_v41 = vpop.permute.xlu0 %654  ;;  %422 = vmatpush.msra.mxu0 %v381_v37 }
  0x9f   : > { %449 = vmatpush.msra.mxu1 %v2181_v36 }
  0xa0   : > { %v657_v46 = vpop.permute.xlu1 %656  ;;  %423 = vmatpush.msra.mxu0 %v380_v43  ;;  %1983 = vmatmul.msk.f32.vlgmr.msra.gmra.mxu1 %vm393_vm1, %v1975_v40 }
  0xa1   : > { %2012 = vmatpush.msk.msrb.mxu3 %vm403_vm0, %v657_v46  ;;  %v663_v47 = vsel %vm658_vm3, %v655_v41, %v657_v46  ;;  %1979 = vmatmul.msk.f32.vlgmr.msra.gmra.mxu0 %vm393_vm1, %v1975_v40  ;;  %v2219_v53 = vpop.permute.xlu2 %2218 }
  0xa2   : > { %2008 = vmatpush.msk.msrb.mxu2 %vm403_vm0, %v663_v47  ;;  %v2220_v7 = vunpack.i.l.bf16 %v2219_v53  ;;  %v2221_v9 = vunpack.i.h.bf16 %v2219_v53 }
  0xa3   : > { %723 = vmatpush.msrb.mxu3 %v2186_v39 }
  0xa4   : > { %697 = vmatpush.msrb.mxu2 %v662_v48  ;;  %v550_v15 = vsel %vm549_vm4, %v2220_v7, %v2221_v9 }
  0xa5   : > { %724 = vmatpush.msrb.mxu3 %v2191_v45 }
  0xa6   : > { %v546_v51 = vpop.permute.xlu0 %545  ;;  %698 = vmatpush.msrb.mxu2 %v661_v49 }
  0xa8   : > { %v548_v52 = vpop.permute.xlu1 %547  ;;  %1984 = vmatmul.msk.f32.gmra.mxu1 %vm393_vm1, %v1976_v50  ;;  %v2671_v7 = vpop.f32.mrf.mxu2 }
  0xa9   : > { %2001 = vmatpush.msk.msrb.mxu1 %vm403_vm0, %v548_v52  ;;  %v554_v54 = vsel %vm549_vm4, %v546_v51, %v548_v52  ;;  %1980 = vmatmul.msk.f32.gmra.mxu0 %vm393_vm1, %v1976_v50  ;;  %v2224_v2 = vpop.permute.xlu2 %2223  ;;  %v2027_v52 = vld [vmem:[%s3026_s1 + $0x78] sm:$0xff] }
  0xaa   : > { %1997 = vmatpush.msk.msrb.mxu0 %vm403_vm0, %v554_v54  ;;  %v2226_v18 = vunpack.i.h.bf16 %v2224_v2  ;;  %v2225_v19 = vunpack.i.l.bf16 %v2224_v2 }
  0xac   : > { %v880_v26 = vsel %vm876_vm5, %v2225_v19, %v2226_v18 }
  0xae   : > { %v2194_v58 = vpop.permute.xlu0 %2193 }
  0xaf   : > { %v2195_v59 = vunpack.i.l.bf16 %v2194_v58  ;;  %v2196_v60 = vunpack.i.h.bf16 %v2194_v58 }
  0xb0   : > { %v2199_v61 = vpop.permute.xlu1 %2198  ;;  %1985 = vmatmul.msk.f32.gmra.mxu1 %vm393_vm1, %v1977_v57 }
  0xb1   : > { %v2200_v62 = vunpack.i.l.bf16 %v2199_v61  ;;  %614 = vmatpush.msrb.mxu1 %v2196_v60  ;;  %v553_v63 = vsel %vm549_vm4, %v2195_v59, %v2196_v60  ;;  %v2201_v0 = vunpack.i.h.bf16 %v2199_v61  ;;  %1981 = vmatmul.msk.f32.gmra.mxu0 %vm393_vm1, %v1977_v57  ;;  %v2229_v17 = vpop.permute.xlu2 %2228  ;;  %v2016_v59 = vld [vmem:[%s3026_s1 + $0x60] sm:$0xff]  ;;  %v2017_v61 = vld [vmem:[%s3026_s1 + $0x68] sm:$0xff] }
  0xb2   : > { %588 = vmatpush.msrb.mxu0 %v553_v63  ;;  %v2231_v22 = vunpack.i.h.bf16 %v2229_v17  ;;  %v2230_v23 = vunpack.i.l.bf16 %v2229_v17  ;;  %v2028_v60 = vld [vmem:[%s3026_s1 + $0x80] sm:$0xff]  ;;  %v2018_v63 = vld [vmem:[%s3026_s1 + $0x70] sm:$0xff] }
  0xb3   : > { %725 = vmatpush.msrb.mxu3 %v2201_v0  ;;  %v660_v3 = vsel %vm658_vm3, %v2200_v62, %v2201_v0  ;;  %615 = vmatpush.msrb.mxu1 %v2206_v56  ;;  %v2029_v62 = vld [vmem:[%s3026_s1 + $0x88] sm:$0xff]  ;;  %v992_v0 = vld [vmem:[%s3028_s3 + $0xf8] sm:$0x7] }
  0xb4   : > { %699 = vmatpush.msrb.mxu2 %v660_v3  ;;  %589 = vmatpush.msrb.mxu0 %v552_v1  ;;  %v879_v28 = vsel %vm876_vm5, %v2230_v23, %v2231_v22  ;;  %v976_v1 = vld [vmem:[%s3028_s3 + $0x78] sm:$0xff]  ;;  %v969_v23 = vld [vmem:[%s3028_s3 + $0x40] sm:$0xff] }
  0xb6   : > { %v2209_v4 = vpop.permute.xlu0 %2208 }
  0xb7   : > { %v2210_v5 = vunpack.i.l.bf16 %v2209_v4  ;;  %v2211_v6 = vunpack.i.h.bf16 %v2209_v4  ;;  %v991_v4 = vld [vmem:[%s3028_s3 + $0xf0] sm:$0xff] }
  0xb8   : > { %v2214_v10 = vpop.permute.xlu1 %2213 }
  0xb9   : > { %v2215_v11 = vunpack.i.l.bf16 %v2214_v10  ;;  %726 = vmatpush.msrb.mxu3 %v2211_v6  ;;  %v659_v12 = vsel %vm658_vm3, %v2210_v5, %v2211_v6  ;;  %v2216_v13 = vunpack.i.h.bf16 %v2214_v10  ;;  %v2244_v33 = vpop.permute.xlu2 %2243  ;;  %v2666_v5 = vpop.f32.mrf.mxu3  ;;  %v975_v6 = vld [vmem:[%s3028_s3 + $0x70] sm:$0xff]  ;;  %v989_v10 = vld [vmem:[%s3028_s3 + $0xe0] sm:$0xff] }
  0xba   : > { %700 = vmatpush.msrb.mxu2 %v659_v12  ;;  %2013 = vmatmul.msk.f32.vlgmr.msrb.gmra.mxu3 %vm393_vm1, %v2005_v8  ;;  %v2246_v35 = vunpack.i.h.bf16 %v2244_v33  ;;  %v2245_v36 = vunpack.i.l.bf16 %v2244_v33  ;;  %v988_v12 = vld [vmem:[%s3028_s3 + $0xd8] sm:$0xff] }
  0xbb   : > { %616 = vmatpush.msrb.mxu1 %v2216_v13  ;;  %2009 = vmatmul.msk.f32.vlgmr.msrb.gmra.mxu2 %vm393_vm1, %v2005_v8  ;;  %v551_v14 = vsel %vm549_vm4, %v2215_v11, %v2216_v13  ;;  %v990_v8 = vld [vmem:[%s3028_s3 + $0xe8] sm:$0xff]  ;;  %v973_v11 = vld [vmem:[%s3028_s3 + $0x60] sm:$0xff]  ;;  %v972_v13 = vld [vmem:[%s3028_s3 + $0x58] sm:$0xff]  ;;  %vm1150_vm4 = vcmask 195584  }
  0xbc   : > { %590 = vmatpush.msrb.mxu0 %v551_v14  ;;  %v770_v44 = vsel %vm767_vm6, %v2245_v36, %v2246_v35  ;;  %v987_v14 = vld [vmem:[%s3028_s3 + $0xd0] sm:$0xff]  ;;  %v964_v36 = vld [vmem:[%s3028_s3 + $0x18] sm:$0xff] }
  0xbd   : > { %617 = vmatpush.msrb.mxu1 %v2221_v9  ;;  %v974_v9 = vld [vmem:[%s3028_s3 + $0x68] sm:$0xff] }
  0xbe   : > { %v873_v20 = vpop.permute.xlu0 %872  ;;  %591 = vmatpush.msrb.mxu0 %v550_v15  ;;  %2002 = vmatmul.msk.f32.vlgmr.msrb.gmra.mxu1 %vm393_vm1, %v1994_v16 }
  0xbf   : > { %1998 = vmatmul.msk.f32.vlgmr.msrb.gmra.mxu0 %vm393_vm1, %v1994_v16  ;;  %v971_v16 = vld [vmem:[%s3028_s3 + $0x50] sm:$0xff] }
  0xc0   : > { %v875_v24 = vpop.permute.xlu1 %874 }
  0xc1   : > { %v881_v25 = vsel %vm876_vm5, %v873_v20, %v875_v24  ;;  %2034 = vmatpush.msk.msra.mxu3 %vm403_vm0, %v875_v24  ;;  %v2259_v46 = vpop.permute.xlu2 %2258  ;;  %v2704_v19 = vpop.f32.mrf.mxu3  ;;  %v970_v20 = vld [vmem:[%s3028_s3 + $0x48] sm:$0xff]  ;;  %v984_v24 = vld [vmem:[%s3028_s3 + $0xb8] sm:$0xff] }
  0xc2   : > { %2014 = vmatmul.msk.f32.gmra.mxu3 %vm393_vm1, %v2006_v21  ;;  %2030 = vmatpush.msk.msra.mxu2 %vm403_vm0, %v881_v25  ;;  %v2261_v50 = vunpack.i.h.bf16 %v2259_v46  ;;  %v2260_v51 = vunpack.i.l.bf16 %v2259_v46  ;;  %v968_v25 = vld [vmem:[%s3028_s3 + $0x38] sm:$0xff] }
  0xc3   : > { %2010 = vmatmul.msk.f32.gmra.mxu2 %vm393_vm1, %v2006_v21  ;;  %941 = vmatpush.msra.mxu3 %v2226_v18  ;;  %v986_v18 = vld [vmem:[%s3028_s3 + $0xc8] sm:$0xff]  ;;  %v2709_v21 = vpop.f32.mrf.mxu2 }
  0xc4   : > { %915 = vmatpush.msra.mxu2 %v880_v26  ;;  %v768_v58 = vsel %vm767_vm6, %v2260_v51, %v2261_v50  ;;  %v983_v26 = vld [vmem:[%s3028_s3 + $0xb0] sm:$0xff] }
  0xc5   : > { %942 = vmatpush.msra.mxu3 %v2231_v22  ;;  %v985_v22 = vld [vmem:[%s3028_s3 + $0xc0] sm:$0xff] }
  0xc6   : > { %v764_v29 = vpop.permute.xlu0 %763  ;;  %2003 = vmatmul.msk.f32.gmra.mxu1 %vm393_vm1, %v1995_v27  ;;  %916 = vmatpush.msra.mxu2 %v879_v28  ;;  %v982_v28 = vld [vmem:[%s3028_s3 + $0xa8] sm:$0xff] }
  0xc7   : > { %1999 = vmatmul.msk.f32.gmra.mxu0 %vm393_vm1, %v1995_v27  ;;  %v967_v27 = vld [vmem:[%s3028_s3 + $0x30] sm:$0xff] }
  0xc8   : > { %v766_v31 = vpop.permute.xlu1 %765 }
  0xc9   : > { %v772_v32 = vsel %vm767_vm6, %v764_v29, %v766_v31  ;;  %2023 = vmatpush.msk.msra.mxu1 %vm403_vm0, %v766_v31  ;;  %v966_v29 = vld [vmem:[%s3028_s3 + $0x28] sm:$0xff] }
  0xca   : > { %2015 = vmatmul.msk.f32.gmra.mxu3 %vm393_vm1, %v2007_v30  ;;  %2019 = vmatpush.msk.msra.mxu0 %vm403_vm0, %v772_v32  ;;  %v965_v32 = vld [vmem:[%s3028_s3 + $0x20] sm:$0xff] }
  0xcb   : > { %2011 = vmatmul.msk.f32.gmra.mxu2 %vm393_vm1, %v2007_v30  ;;  %v981_v30 = vld [vmem:[%s3028_s3 + $0xa0] sm:$0xff] }
  0xce   : > { %v2234_v37 = vpop.permute.xlu0 %2233  ;;  %2004 = vmatmul.msk.f32.gmra.mxu1 %vm393_vm1, %v1996_v34 }
  0xcf   : > { %v2236_v38 = vunpack.i.h.bf16 %v2234_v37  ;;  %v2235_v39 = vunpack.i.l.bf16 %v2234_v37  ;;  %2000 = vmatmul.msk.f32.gmra.mxu0 %vm393_vm1, %v1996_v34  ;;  %v980_v34 = vld [vmem:[%s3028_s3 + $0x98] sm:$0xff]  ;;  %v2753_v37 = vpop.f32.mrf.mxu2 }
  0xd0   : > { %v2239_v40 = vpop.permute.xlu1 %2238 }
  0xd1   : > { %v2241_v41 = vunpack.i.h.bf16 %v2239_v40  ;;  %v2240_v42 = vunpack.i.l.bf16 %v2239_v40  ;;  %832 = vmatpush.msra.mxu1 %v2236_v38  ;;  %v771_v43 = vsel %vm767_vm6, %v2235_v39, %v2236_v38  ;;  %v979_v38 = vld [vmem:[%s3028_s3 + $0x90] sm:$0xff]  ;;  %v978_v40 = vld [vmem:[%s3028_s3 + $0x88] sm:$0xff] }
  0xd2   : > { %806 = vmatpush.msra.mxu0 %v771_v43  ;;  %v963_v39 = vld [vmem:[%s3028_s3 + $0x10] sm:$0xff] }
  0xd3   : > { %943 = vmatpush.msra.mxu3 %v2241_v41  ;;  %v878_v45 = vsel %vm876_vm5, %v2240_v42, %v2241_v41  ;;  %833 = vmatpush.msra.mxu1 %v2246_v35  ;;  %v2748_v35 = vpop.f32.mrf.mxu3  ;;  %v962_v41 = vld [vmem:[%s3028_s3 + $0x8] sm:$0xff]  ;;  %v977_v42 = vld [vmem:[%s3028_s3 + $0x80] sm:$0xff] }
  0xd4   : > { %917 = vmatpush.msra.mxu2 %v878_v45  ;;  %807 = vmatpush.msra.mxu0 %v770_v44  ;;  %v961_v44 = vld [vmem:[%s3028_s3] sm:$0xff] }
  0xd6   : > { %v2249_v47 = vpop.permute.xlu0 %2248 }
  0xd7   : > { %v2251_v48 = vunpack.i.h.bf16 %v2249_v47  ;;  %v2250_v49 = vunpack.i.l.bf16 %v2249_v47 }
  0xd8   : > { %v2254_v53 = vpop.permute.xlu1 %2253 }
  0xd9   : > { %v2256_v54 = vunpack.i.h.bf16 %v2254_v53  ;;  %v2255_v55 = vunpack.i.l.bf16 %v2254_v53  ;;  %944 = vmatpush.msra.mxu3 %v2251_v48  ;;  %v877_v56 = vsel %vm876_vm5, %v2250_v49, %v2251_v48  ;;  %v995_v53 = vld [vmem:[%s3027_s2 + $0x10] sm:$0xff] }
  0xda   : > { %918 = vmatpush.msra.mxu2 %v877_v56  ;;  %2035 = vmatmul.msk.f32.vlgmr.msra.gmra.mxu3 %vm393_vm1, %v2027_v52 }
  0xdb   : > { %834 = vmatpush.msra.mxu1 %v2256_v54  ;;  %2031 = vmatmul.msk.f32.vlgmr.msra.gmra.mxu2 %vm393_vm1, %v2027_v52  ;;  %v769_v57 = vsel %vm767_vm6, %v2255_v55, %v2256_v54  ;;  %v994_v52 = vld [vmem:[%s3027_s2 + $0x8] sm:$0xff]  ;;  %v2383_v54 = vmov 0   ;;  %v993_v55 = vld [vmem:[%s3027_s2] sm:$0xff]  ;;  %vm1409_vm6 = vcmask 990208  }
  0xdc   : > { %808 = vmatpush.msra.mxu0 %v769_v57  ;;  %2263 = vset.pattern.permute.xlu1 %v2383_v54 }
  0xdd   : > { %835 = vmatpush.msra.mxu1 %v2261_v50  ;;  %2262 = vset.pattern.permute.xlu0 %v2383_v54 }
  0xde   : > { %809 = vmatpush.msra.mxu0 %v768_v58  ;;  %2024 = vmatmul.msk.f32.vlgmr.msra.gmra.mxu1 %vm393_vm1, %v2016_v59 }
  0xdf   : > { %2020 = vmatmul.msk.f32.vlgmr.msra.gmra.mxu0 %vm393_vm1, %v2016_v59  ;;  %2038 = vmatpush.msk.msrb.mxu1 %vm1020_vm7, %v992_v0 }
  0xe0   : > { %1024 = vmatpush.msrb.mxu0 %v976_v1  ;;  %1003 = vperm.xlu1 %2263, %v994_v52  }
  0xe1   : > { %1051 = vmatpush.msrb.mxu1 %v991_v4  ;;  %1008 = vperm.xlu0 %2262, %v995_v53  }
  0xe2   : > { %2036 = vmatmul.msk.f32.gmra.mxu3 %vm393_vm1, %v2028_v60  ;;  %1025 = vmatpush.msrb.mxu0 %v975_v6 }
  0xe3   : > { %2032 = vmatmul.msk.f32.gmra.mxu2 %vm393_vm1, %v2028_v60  ;;  %1052 = vmatpush.msrb.mxu1 %v990_v8 }
  0xe4   : > { %1026 = vmatpush.msrb.mxu0 %v974_v9  ;;  %2264 = vset.pattern.permute.xlu2 %v2383_v54 }
  0xe5   : > { %1053 = vmatpush.msrb.mxu1 %v989_v10  ;;  %998 = vperm.xlu2 %2264, %v993_v55  }
  0xe6   : > { %2025 = vmatmul.msk.f32.gmra.mxu1 %vm393_vm1, %v2017_v61  ;;  %1027 = vmatpush.msrb.mxu0 %v973_v11 }
  0xe7   : > { %2021 = vmatmul.msk.f32.gmra.mxu0 %vm393_vm1, %v2017_v61  ;;  %1054 = vmatpush.msrb.mxu1 %v988_v12 }
  0xe8   : > { %1028 = vmatpush.msrb.mxu0 %v972_v13 }
  0xe9   : > { %1055 = vmatpush.msrb.mxu1 %v987_v14 }
  0xea   : > { %2037 = vmatmul.msk.f32.gmra.mxu3 %vm393_vm1, %v2029_v62  ;;  %1029 = vmatpush.msrb.mxu0 %v971_v16 }
  0xeb   : > { %2033 = vmatmul.msk.f32.gmra.mxu2 %vm393_vm1, %v2029_v62  ;;  %1056 = vmatpush.msrb.mxu1 %v986_v18 }
  0xec   : > { %1030 = vmatpush.msrb.mxu0 %v970_v20 }
  0xed   : > { %1057 = vmatpush.msrb.mxu1 %v985_v22 }
  0xee   : > { %2026 = vmatmul.msk.f32.gmra.mxu1 %vm393_vm1, %v2018_v63  ;;  %1031 = vmatpush.msrb.mxu0 %v969_v23 }
  0xef   : > { %2022 = vmatmul.msk.f32.gmra.mxu0 %vm393_vm1, %v2018_v63  ;;  %1058 = vmatpush.msrb.mxu1 %v984_v24 }
  0xf0   : > { %1032 = vmatpush.msrb.mxu0 %v968_v25 }
  0xf1   : > { %1059 = vmatpush.msrb.mxu1 %v983_v26 }
  0xf2   : > { %1033 = vmatpush.msrb.mxu0 %v967_v27 }
  0xf3   : > { %1060 = vmatpush.msrb.mxu1 %v982_v28 }
  0xf4   : > { %1034 = vmatpush.msrb.mxu0 %v966_v29 }
  0xf5   : > { %1061 = vmatpush.msrb.mxu1 %v981_v30 }
  0xf6   : > { %1035 = vmatpush.msrb.mxu0 %v965_v32 }
  0xf7   : > { %1062 = vmatpush.msrb.mxu1 %v980_v34 }
  0xf8   : > { %1036 = vmatpush.msrb.mxu0 %v964_v36 }
  0xf9   : > { %1063 = vmatpush.msrb.mxu1 %v979_v38 }
  0xfa   : > { %1037 = vmatpush.msrb.mxu0 %v963_v39 }
  0xfb   : > { %1064 = vmatpush.msrb.mxu1 %v978_v40 }
  0xfc   : > { %1038 = vmatpush.msrb.mxu0 %v962_v41 }
  0xfd   : > { %1065 = vmatpush.msrb.mxu1 %v977_v42 }
  0xfe   : > { %1039 = vmatpush.msrb.mxu0 %v961_v44 }
 0x11d   : > { %v2659_v2 = vpop.f32.mrf.mxu1 }
 0x11e   : > { %v2661_v3 = vpop.f32.mrf.mxu0  ;;  %v517_v57 = vadd.f32 %v2666_v5, %v2659_v2 }
 0x11f   : > { %v491_v59 = vadd.f32 %v2671_v7, %v2661_v3 }
 0x125   : > { %v2694_v15 = vpop.f32.mrf.mxu1 }
 0x126   : > { %v2699_v17 = vpop.f32.mrf.mxu0  ;;  %v520_v6 = vadd.f32 %v2704_v19, %v2694_v15 }
 0x127   : > { %v494_v2 = vadd.f32 %v2709_v21, %v2699_v17 }
 0x12d   : > { %v2738_v31 = vpop.f32.mrf.mxu1 }
 0x12e   : > { %v2743_v33 = vpop.f32.mrf.mxu0  ;;  %v523_v15 = vadd.f32 %v2748_v35, %v2738_v31 }
 0x12f   : > { %v497_v17 = vadd.f32 %v2753_v37, %v2743_v33 }
 0x13b   : > { %v619_v43 = vpop.f32.mrf.mxu1 }
 0x13c   : > { %v593_v45 = vpop.f32.mrf.mxu0  ;;  %v629_v61 = vadd.f32 %v619_v43, %v517_v57 }
 0x13d   : > { %v728_v46 = vpop.f32.mrf.mxu3  ;;  %v628_v63 = vadd.f32 %v593_v45, %v491_v59 }
 0x13e   : > { %v702_v47 = vpop.f32.mrf.mxu2  ;;  %v738_v0 = vadd.f32 %v728_v46, %v629_v61 }
 0x13f   : > { %v737_v1 = vadd.f32 %v702_v47, %v628_v63  ;;  %v999_v37 = vpop.permute.xlu2 %998 }
 0x143   : > { %v622_v48 = vpop.f32.mrf.mxu1 }
 0x144   : > { %v596_v49 = vpop.f32.mrf.mxu0  ;;  %v631_v11 = vadd.f32 %v622_v48, %v520_v6 }
 0x145   : > { %v731_v50 = vpop.f32.mrf.mxu3  ;;  %v630_v12 = vadd.f32 %v596_v49, %v494_v2 }
 0x146   : > { %v705_v51 = vpop.f32.mrf.mxu2  ;;  %v740_v14 = vadd.f32 %v731_v50, %v631_v11 }
 0x147   : > { %v739_v16 = vadd.f32 %v705_v51, %v630_v12 }
 0x14b   : > { %v625_v56 = vpop.f32.mrf.mxu1 }
 0x14c   : > { %v599_v58 = vpop.f32.mrf.mxu0  ;;  %v633_v23 = vadd.f32 %v625_v56, %v523_v15 }
 0x14d   : > { %v734_v60 = vpop.f32.mrf.mxu3  ;;  %v632_v26 = vadd.f32 %v599_v58, %v497_v17 }
 0x14e   : > { %v708_v62 = vpop.f32.mrf.mxu2  ;;  %v742_v28 = vadd.f32 %v734_v60, %v633_v23 }
 0x14f   : > { %v741_v29 = vadd.f32 %v708_v62, %v632_v26 }
 0x152   : > { %v1004_v44 = vpop.permute.xlu1 %1003 }
 0x153   : > { %v1009_v52 = vpop.permute.xlu0 %1008 }
 0x15b   : > { %v837_v4 = vpop.f32.mrf.mxu1 }
 0x15c   : > { %v847_v8 = vadd.f32 %v837_v4, %v738_v0  ;;  %v811_v9 = vpop.f32.mrf.mxu0 }
 0x15d   : > { %v846_v5 = vadd.f32 %v811_v9, %v737_v1  ;;  %v946_v10 = vpop.f32.mrf.mxu3 }
 0x15e   : > { %v956_v3 = vadd.f32 %v946_v10, %v847_v8  ;;  %v920_v7 = vpop.f32.mrf.mxu2 }
 0x15f   : > { %v955_v13 = vadd.f32 %v920_v7, %v846_v5 }
 0x160   : > { %2039 = vmatmul.msk.f32.vlgmr.msrb.gmra.mxu1 %vm876_vm5, %v956_v3 }
 0x161   : > { %1040 = vmatmul.f32.vlgmr.msrb.gmra.mxu0 %v955_v13 }
 0x163   : > { %v840_v18 = vpop.f32.mrf.mxu1 }
 0x164   : > { %v849_v19 = vadd.f32 %v840_v18, %v740_v14  ;;  %v814_v20 = vpop.f32.mrf.mxu0 }
 0x165   : > { %v848_v21 = vadd.f32 %v814_v20, %v739_v16  ;;  %v949_v22 = vpop.f32.mrf.mxu3 }
 0x166   : > { %v958_v24 = vadd.f32 %v949_v22, %v849_v19  ;;  %v923_v25 = vpop.f32.mrf.mxu2 }
 0x167   : > { %v957_v27 = vadd.f32 %v923_v25, %v848_v21 }
 0x168   : > { %2040 = vmatmul.msk.f32.gmra.mxu1 %vm876_vm5, %v958_v24 }
 0x169   : > { %1043 = vmatmul.f32.gmra.mxu0 %v957_v27 }
 0x16b   : > { %v843_v30 = vpop.f32.mrf.mxu1 }
 0x16c   : > { %v851_v32 = vadd.f32 %v843_v30, %v742_v28  ;;  %v817_v31 = vpop.f32.mrf.mxu0  ;;  %v1397_v30 = vld [vmem:[%s3030_s5] sm:$0xff] }
 0x16d   : > { %v850_v34 = vadd.f32 %v817_v31, %v741_v29  ;;  %v952_v35 = vpop.f32.mrf.mxu3  ;;  %v1398_v29 = vld [vmem:[%s3030_s5 + $0x8] sm:$0xf] }
 0x16e   : > { %v960_v36 = vadd.f32 %v952_v35, %v851_v32  ;;  %v926_v38 = vpop.f32.mrf.mxu2 }
 0x16f   : > { %v959_v33 = vadd.f32 %v926_v38, %v850_v34  ;;  %v1133_v34 = vld [vmem:[%s3029_s4] sm:$0xff] }
 0x170   : > { %2041 = vmatmul.msk.f32.gmra.mxu1 %vm876_vm5, %v960_v36  ;;  %vm1416_vm5 = vcmask 1040384  }
 0x171   : > { %1046 = vmatmul.f32.gmra.mxu0 %v959_v33  ;;  %v1134_v33 = vld [vmem:[%s3029_s4 + $0x8] sm:$0xf] }
 0x1dd   : > { %v1067_v39 = vpop.f32.mrf.mxu1 }
 0x1de   : > { %v1041_v40 = vpop.f32.mrf.mxu0 }
 0x1df   : > { %v1042_v41 = vadd.f32 %v1041_v40, %v999_v37 }
 0x1e1   : > { %v1068_v42 = vadd.f32 %v1067_v39, %v1042_v41 }
 0x1e3   : > { %v2042_v43 = vmul.f32 -1.442695, %v1068_v42  ;;  %v2045_v42 = vld [vmem:[%s3029_s4 + $0x10] sm:$0xff] }
 0x1e5   : > { %2290 = vpow2.f32 %v2042_v43  ;;  %v1070_v45 = vpop.f32.mrf.mxu1 }
 0x1e6   : > { %v1044_v46 = vpop.f32.mrf.mxu0 }
 0x1e7   : > { %v1045_v47 = vadd.f32 %v1044_v46, %v1004_v44 }
 0x1e9   : > { %v1071_v48 = vadd.f32 %v1070_v45, %v1045_v47 }
 0x1eb   : > { %v2291_v49 = vpop.eup %2290  ;;  %v2043_v50 = vmul.f32 -1.442695, %v1071_v48  ;;  %v1396_v48 = vld [vmem:[%s3031_s6 + $0x78] sm:$0x1] }
 0x1ec   : > { %v1085_v51 = vadd.f32 1.0, %v2291_v49 }
 0x1ed   : > { %2292 = vpow2.f32 %v2043_v50  ;;  %v1073_v55 = vpop.f32.mrf.mxu1  ;;  %v2046_v50 = vld [vmem:[%s3029_s4 + $0x18] sm:$0xf] }
 0x1ee   : > { %2294 = vrcp.f32 %v1085_v51  ;;  %v1047_v53 = vpop.f32.mrf.mxu0  ;;  %v1099_v63 = vand.u32 2147483648, %v1085_v51  ;;  %v1097_v1 = vand.u32 2147483647, %v1085_v51  ;;  %vm1093_vm9 = vweird.f32 %v1085_v51 }
 0x1ef   : > { %v1048_v54 = vadd.f32 %v1047_v53, %v1009_v52  ;;  %v1395_v52 = vld [vmem:[%s3031_s6 + $0x70] sm:$0xff] }
 0x1f0   : > { %v1100_v2 = vor.u32 1.1754944e-38, %v1099_v63  ;;  %vm1098_vm11 = vcmp.eq.f32.partialorder %v1097_v1, 8.507059e+37  ;;  %v2052_v63 = vld [vmem:[%s3029_s4 + $0x28] sm:$0xf]  ;;  %v2064_v1 = vld [vmem:[%s3029_s4 + $0x58] sm:$0xf] }
 0x1f1   : > { %v1074_v56 = vadd.f32 %v1073_v55, %v1048_v54  ;;  %v1394_v54 = vld [vmem:[%s3031_s6 + $0x68] sm:$0xff] }
 0x1f3   : > { %v2293_v57 = vpop.eup %2292  ;;  %v2044_v58 = vmul.f32 -1.442695, %v1074_v56 }
 0x1f4   : > { %v2295_v59 = vpop.eup %2294  ;;  %v1086_v60 = vadd.f32 1.0, %v2293_v57  ;;  %v2051_v57 = vld [vmem:[%s3029_s4 + $0x20] sm:$0xff] }
 0x1f5   : > { %v1089_v61 = vmul.f32 %v2295_v59, %v1085_v51  ;;  %2296 = vpow2.f32 %v2044_v58  ;;  %vm1094_vm8 = vweird.f32 %v2295_v59  ;;  %v2055_v51 = vld [vmem:[%s3029_s4 + $0x30] sm:$0xff]  ;;  %v2056_v58 = vld [vmem:[%s3029_s4 + $0x38] sm:$0xf] }
 0x1f6   : > { %2298 = vrcp.f32 %v1086_v60  ;;  %vm1095_vm10 = vmor %vm1093_vm9, %vm1094_vm8  ;;  %vm1108_vm13 = vweird.f32 %v1086_v60  ;;  %v1114_v18 = vand.u32 2147483648, %v1086_v60  ;;  %v1112_v17 = vand.u32 2147483647, %v1086_v60 }
 0x1f7   : > { %v1090_v62 = vsub.f32 1.0, %v1089_v61  ;;  %v2063_v61 = vld [vmem:[%s3029_s4 + $0x50] sm:$0xff] }
 0x1f8   : > { %v1115_v24 = vor.u32 1.1754944e-38, %v1114_v18  ;;  %vm1113_vm3 = vcmp.eq.f32.partialorder %v1112_v17, 8.507059e+37 }
 0x1f9   : > { %v1091_v0 = vmul.f32 %v2295_v59, %v1090_v62 }
 0x1fb   : > { %v2297_v4 = vpop.eup %2296  ;;  %v1092_v6 = vadd.f32 %v2295_v59, %v1091_v0  ;;  %v2060_v0 = vld [vmem:[%s3029_s4 + $0x48] sm:$0xf] }
 0x1fc   : > { %v2299_v8 = vpop.eup %2298  ;;  %v1087_v9 = vadd.f32 1.0, %v2297_v4  ;;  %v1393_v4 = vld [vmem:[%s3031_s6 + $0x60] sm:$0xff] }
 0x1fd   : > { %v1104_v5 = vmul.f32 %v2299_v8, %v1086_v60  ;;  %v1096_v10 = vsel %vm1095_vm10, %v2295_v59, %v1092_v6  ;;  %vm1109_vm12 = vweird.f32 %v2299_v8  ;;  %v2059_v60 = vld [vmem:[%s3029_s4 + $0x40] sm:$0xff]  ;;  %v1392_v6 = vld [vmem:[%s3031_s6 + $0x58] sm:$0xff] }
 0x1fe   : > { %2300 = vrcp.f32 %v1087_v9  ;;  %v1101_v11 = vsel %vm1098_vm11, %v1100_v2, %v1096_v10  ;;  %v1129_v15 = vand.u32 2147483648, %v1087_v9  ;;  %v1127_v20 = vand.u32 2147483647, %v1087_v9  ;;  %vm1110_vm15 = vmor %vm1108_vm13, %vm1109_vm12  ;;  %v1389_v2 = vld [vmem:[%s3031_s6 + $0x40] sm:$0xff]  ;;  %v1387_v10 = vld [vmem:[%s3031_s6 + $0x30] sm:$0xff] }
 0x1ff   : > { %v1105_v3 = vsub.f32 1.0, %v1104_v5  ;;  %1141 = vrot.lane.b32.xlu2 %v1101_v11, %s2378_s27  ;;  %vm1123_vm0 = vweird.f32 %v1087_v9  ;;  %v1388_v5 = vld [vmem:[%s3031_s6 + $0x38] sm:$0xff] }
 0x200   : > { %v1130_v23 = vor.u32 1.1754944e-38, %v1129_v15  ;;  %vm1128_vm2 = vcmp.eq.f32.partialorder %v1127_v20, 8.507059e+37 }
 0x201   : > { %v1106_v7 = vmul.f32 %v2299_v8, %v1105_v3  ;;  %v1385_v3 = vld [vmem:[%s3031_s6 + $0x20] sm:$0xff] }
 0x203   : > { %v1107_v16 = vadd.f32 %v2299_v8, %v1106_v7  ;;  %v1384_v7 = vld [vmem:[%s3031_s6 + $0x18] sm:$0xff] }
 0x204   : > { %v2301_v12 = vpop.eup %2300 }
 0x205   : > { %v1119_v13 = vmul.f32 %v2301_v12, %v1087_v9  ;;  %vm1124_vm14 = vweird.f32 %v2301_v12  ;;  %v1111_v22 = vsel %vm1110_vm15, %v2299_v8, %v1107_v16  ;;  %v1391_v8 = vld [vmem:[%s3031_s6 + $0x50] sm:$0xff]  ;;  %v1390_v9 = vld [vmem:[%s3031_s6 + $0x48] sm:$0xff]  ;;  %vm1495_vm15 = vcmask 1043456  }
 0x206   : > { %vm1125_vm1 = vmor %vm1123_vm0, %vm1124_vm14  ;;  %v1116_v27 = vsel %vm1113_vm3, %v1115_v24, %v1111_v22  ;;  %vm1491_vm0 = vcmask 97280  }
 0x207   : > { %v1120_v14 = vsub.f32 1.0, %v1119_v13  ;;  %1212 = vrot.lane.b32.xlu2 %v1101_v11, %s3041_s29  ;;  %v1382_v13 = vld [vmem:[%s3031_s6 + $0x8] sm:$0xff] }
 0x209   : > { %v1121_v19 = vmul.f32 %v2301_v12, %v1120_v14  ;;  %v1381_v14 = vld [vmem:[%s3031_s6] sm:$0xff] }
 0x20b   : > { %v1122_v21 = vadd.f32 %v2301_v12, %v1121_v19 }
 0x20d   : > { %v1126_v25 = vsel %vm1125_vm1, %v2301_v12, %v1122_v21  ;;  %v1383_v12 = vld [vmem:[%s3031_s6 + $0x10] sm:$0xff] }
 0x20e   : > { %v1131_v26 = vsel %vm1128_vm2, %v1130_v23, %v1126_v25 }
 0x20f   : > { %1199 = vmatpush.msrb.mxu3 %v1131_v26  ;;  %v2270_v28 = vpack.i.bf16 %v1116_v27, %v1131_v26 }
 0x211   : > { %2271 = vrot.lane.b32.xlu0 %v2270_v28, %s3041_s29  ;;  %2266 = vrot.lane.b32.xlu1 %v2270_v28, %s2378_s27  ;;  %s3048_s29 = smov 123  }
 0x212   : > { %1200 = vmatpush.msrb.mxu3 %v1116_v27  ;;  %2286 = vrot.lane.b32.xlu2 %v2270_v28, %s3039_s30 }
 0x214   : > { %1201 = vmatpush.msrb.mxu3 %v1101_v11 }
 0x215   : > { %2049 = vmatmul.msk.f32.vlgmr.msrb.gmra.mxu3 %vm1150_vm4, %v1133_v34 }
 0x219   : > { %2276 = vrot.lane.b32.xlu1 %v2270_v28, %s3045_s15  ;;  %1255 = vrot.lane.b32.xlu0 %v1101_v11, %s3045_s15 }
 0x21a   : > { %1406 = vperm.xlu2 %2264, %v1398_v29  }
 0x21d   : > { %2050 = vmatmul.msk.f32.gmra.mxu3 %vm1150_vm4, %v1134_v33 }
 0x221   : > { %2281 = vrot.lane.b32.xlu1 %v2270_v28, %s3046_s17  ;;  %1298 = vrot.lane.b32.xlu0 %v1101_v11, %s3046_s17 }
 0x229   : > { %1341 = vrot.lane.b32.xlu1 %v1101_v11, %s3039_s30  ;;  %1401 = vperm.xlu0 %2262, %v1397_v30   ;;  %v1386_v11 = vld [vmem:[%s3031_s6 + $0x28] sm:$0xff]  ;;  %s2385_s30 = smov 120  }
 0x259   : > { %v1142_v32 = vpop.permute.xlu2 %1141 }
 0x261   : > { %v1213_v31 = vpop.permute.xlu2 %1212 }
 0x26c   : > { %v2287_v35 = vpop.permute.xlu2 %2286 }
 0x26d   : > { %v2288_v36 = vunpack.i.l.bf16 %v2287_v35  ;;  %v2289_v38 = vunpack.i.h.bf16 %v2287_v35 }
 0x26f   : > { %1369 = vmatpush.msra.mxu1 %v2288_v36 }
 0x271   : > { %1370 = vmatpush.msra.mxu1 %v2289_v38 }
 0x283   : > { %v2267_v37 = vpop.permute.xlu1 %2266  ;;  %v2272_v40 = vpop.permute.xlu0 %2271 }
 0x284   : > { %v2268_v39 = vunpack.i.l.bf16 %v2267_v37  ;;  %v2269_v41 = vunpack.i.h.bf16 %v2267_v37  ;;  %v2273_v43 = vunpack.i.l.bf16 %v2272_v40  ;;  %v2274_v45 = vunpack.i.h.bf16 %v2272_v40 }
 0x286   : > { %1170 = vmatpush.msrb.mxu2 %v2268_v39 }
 0x288   : > { %1171 = vmatpush.msrb.mxu2 %v2269_v41  ;;  %v1407_v41 = vpop.permute.xlu2 %1406 }
 0x28a   : > { %1172 = vmatpush.msrb.mxu2 %v1142_v32 }
 0x28b   : > { %v2277_v44 = vpop.permute.xlu1 %2276  ;;  %2047 = vmatmul.msk.f32.vlgmr.msrb.gmra.mxu2 %vm1150_vm4, %v2045_v42  ;;  %v1256_v49 = vpop.permute.xlu0 %1255 }
 0x28c   : > { %v2278_v46 = vunpack.i.l.bf16 %v2277_v44  ;;  %1240 = vmatpush.msra.mxu2 %v2273_v43  ;;  %v2279_v47 = vunpack.i.h.bf16 %v2277_v44 }
 0x28e   : > { %1241 = vmatpush.msra.mxu2 %v2274_v45  ;;  %1283 = vmatpush.msra.mxu3 %v2278_v46 }
 0x290   : > { %1242 = vmatpush.msra.mxu2 %v1213_v31  ;;  %1284 = vmatpush.msra.mxu3 %v2279_v47 }
 0x292   : > { %2067 = vmatpush.msk.msrb.mxu2 %vm1416_vm5, %v1396_v48  ;;  %1285 = vmatpush.msra.mxu3 %v1256_v49 }
 0x293   : > { %v2282_v53 = vpop.permute.xlu1 %2281  ;;  %2048 = vmatmul.msk.f32.gmra.mxu2 %vm1150_vm4, %v2046_v50  ;;  %2057 = vmatmul.msk.f32.vlgmr.msra.gmra.mxu3 %vm1150_vm4, %v2055_v51  ;;  %v1299_v59 = vpop.permute.xlu0 %1298 }
 0x294   : > { %v2283_v55 = vunpack.i.l.bf16 %v2282_v53  ;;  %1421 = vmatpush.msrb.mxu2 %v1395_v52  ;;  %v2284_v56 = vunpack.i.h.bf16 %v2282_v53 }
 0x296   : > { %1326 = vmatpush.msra.mxu0 %v2283_v55  ;;  %1422 = vmatpush.msrb.mxu2 %v1394_v54 }
 0x298   : > { %1327 = vmatpush.msra.mxu0 %v2284_v56  ;;  %1423 = vmatpush.msrb.mxu2 %v1393_v4  ;;  %v1203_v16 = vpop.f32.mrf.mxu3 }
 0x29a   : > { %1328 = vmatpush.msra.mxu0 %v1299_v59  ;;  %1424 = vmatpush.msrb.mxu2 %v1392_v6 }
 0x29b   : > { %v1342_v62 = vpop.permute.xlu1 %1341  ;;  %2053 = vmatmul.msk.f32.vlgmr.msra.gmra.mxu2 %vm1150_vm4, %v2051_v57  ;;  %2058 = vmatmul.msk.f32.gmra.mxu3 %vm1150_vm4, %v2056_v58  ;;  %v1402_v33 = vpop.permute.xlu0 %1401 }
 0x29c   : > { %1371 = vmatpush.msra.mxu1 %v1342_v62  ;;  %2061 = vmatmul.msk.f32.vlgmr.msra.gmra.mxu0 %vm1150_vm4, %v2059_v60 }
 0x29d   : > { %2065 = vmatmul.msk.f32.vlgmr.msra.gmra.mxu1 %vm1150_vm4, %v2063_v61  ;;  %1425 = vmatpush.msrb.mxu2 %v1391_v8 }
 0x29f   : > { %1426 = vmatpush.msrb.mxu2 %v1390_v9  ;;  %v1873_v9 = vld [vmem:[#allocation2] sm:$0x1] }
 0x2a0   : > { %v1206_v15 = vpop.f32.mrf.mxu3 }
 0x2a1   : > { %1427 = vmatpush.msrb.mxu2 %v1389_v2 }
 0x2a3   : > { %2054 = vmatmul.msk.f32.gmra.mxu2 %vm1150_vm4, %v2052_v63 }
 0x2a4   : > { %2062 = vmatmul.msk.f32.gmra.mxu0 %vm1150_vm4, %v2060_v0  ;;  %1428 = vmatpush.msrb.mxu2 %v1388_v5 }
 0x2a5   : > { %2066 = vmatmul.msk.f32.gmra.mxu1 %vm1150_vm4, %v2064_v1  ;;  %vm1900_vm4 = vcmask 106496  }
 0x2a6   : > { %1429 = vmatpush.msrb.mxu2 %v1387_v10 }
 0x2a8   : > { %1430 = vmatpush.msrb.mxu2 %v1386_v11 }
 0x2aa   : > { %1431 = vmatpush.msrb.mxu2 %v1385_v3 }
 0x2ac   : > { %1432 = vmatpush.msrb.mxu2 %v1384_v7 }
 0x2ae   : > { %1433 = vmatpush.msrb.mxu2 %v1383_v12 }
 0x2b0   : > { %1434 = vmatpush.msrb.mxu2 %v1382_v13  ;;  %v2077_v13 = vld [vmem:[%s3032_s7 + $0x2] sm:$0x1] }
 0x2b2   : > { %1435 = vmatpush.msrb.mxu2 %v1381_v14 }
 0x30e   : > { %v1174_v18 = vpop.f32.mrf.mxu2 }
 0x30f   : > { %v1204_v17 = vadd.f32 %v1203_v16, %v1174_v18 }
 0x316   : > { %v1177_v19 = vpop.f32.mrf.mxu2  ;;  %v1287_v20 = vpop.f32.mrf.mxu3 }
 0x317   : > { %v1207_v27 = vadd.f32 %v1206_v15, %v1177_v19  ;;  %v2080_v15 = vld [vmem:[%s3032_s7 + $0x3] sm:$0x1]  ;;  %v2072_v19 = vld [vmem:[%s3032_s7 + $0x1] sm:$0x1] }
 0x319   : > { %v1330_v22 = vpop.f32.mrf.mxu0 }
 0x31a   : > { %v1373_v24 = vpop.f32.mrf.mxu1 }
 0x31e   : > { %v1244_v21 = vpop.f32.mrf.mxu2  ;;  %v1290_v30 = vpop.f32.mrf.mxu3 }
 0x31f   : > { %v1250_v23 = vadd.f32 %v1244_v21, %v1204_v17 }
 0x321   : > { %v1293_v25 = vadd.f32 %v1287_v20, %v1250_v23  ;;  %v1333_v31 = vpop.f32.mrf.mxu0  ;;  %v1481_v23 = vld [vmem:[%s3032_s7] sm:$0x1] }
 0x322   : > { %v1376_v35 = vpop.f32.mrf.mxu1 }
 0x323   : > { %v1336_v26 = vadd.f32 %v1330_v22, %v1293_v25  ;;  %v2086_v22 = vld [vmem:[%s3032_s7 + $0x5] sm:$0x1] }
 0x325   : > { %v1379_v28 = vadd.f32 %v1373_v24, %v1336_v26  ;;  %v2083_v26 = vld [vmem:[%s3032_s7 + $0x4] sm:$0x1] }
 0x326   : > { %v1247_v29 = vpop.f32.mrf.mxu2 }
 0x327   : > { %v1251_v32 = vadd.f32 %v1247_v29, %v1207_v27  ;;  %2068 = vmatmul.msk.f32.vlgmr.msrb.gmra.mxu2 %vm1409_vm6, %v1379_v28  ;;  %v2089_v27 = vld [vmem:[%s3032_s7 + $0x6] sm:$0x1] }
 0x329   : > { %v1294_v34 = vadd.f32 %v1290_v30, %v1251_v32  ;;  %v2101_v32 = vld [vmem:[%s3032_s7 + $0xa] sm:$0x1] }
 0x32b   : > { %v1337_v36 = vadd.f32 %v1333_v31, %v1294_v34  ;;  %v2092_v31 = vld [vmem:[%s3032_s7 + $0x7] sm:$0x1] }
 0x32d   : > { %v1380_v38 = vadd.f32 %v1376_v35, %v1337_v36  ;;  %v2095_v36 = vld [vmem:[%s3032_s7 + $0x8] sm:$0x1] }
 0x32f   : > { %2069 = vmatmul.msk.f32.gmra.mxu2 %vm1409_vm6, %v1380_v38  ;;  %v2104_v38 = vld [vmem:[%s3032_s7 + $0xb] sm:$0x1] }
 0x3aa   : > { %v1437_v37 = vpop.f32.mrf.mxu2 }
 0x3ab   : > { %v1438_v39 = vadd.f32 %v1437_v37, %v1402_v33  ;;  %v2098_v33 = vld [vmem:[%s3032_s7 + $0x9] sm:$0x1] }
 0x3ad   : > { %v2070_v40 = vmul.f32 -1.442695, %v1438_v39 }
 0x3af   : > { %2302 = vpow2.f32 %v2070_v40 }
 0x3b2   : > { %v1440_v42 = vpop.f32.mrf.mxu2 }
 0x3b3   : > { %v1441_v43 = vadd.f32 %v1440_v42, %v1407_v41 }
 0x3b5   : > { %v2303_v44 = vpop.eup %2302  ;;  %v2071_v45 = vmul.f32 -1.442695, %v1441_v43 }
 0x3b6   : > { %v1449_v46 = vadd.f32 1.0, %v2303_v44 }
 0x3b7   : > { %2304 = vpow2.f32 %v2071_v45 }
 0x3b8   : > { %2306 = vrcp.f32 %v1449_v46  ;;  %v1462_v52 = vand.u32 2147483648, %v1449_v46  ;;  %v1460_v54 = vand.u32 2147483647, %v1449_v46  ;;  %vm1456_vm8 = vweird.f32 %v1449_v46 }
 0x3ba   : > { %v1463_v57 = vor.u32 1.1754944e-38, %v1462_v52  ;;  %vm1461_vm10 = vcmp.eq.f32.partialorder %v1460_v54, 8.507059e+37 }
 0x3bd   : > { %v2305_v47 = vpop.eup %2304 }
 0x3be   : > { %v2307_v48 = vpop.eup %2306  ;;  %v1450_v49 = vadd.f32 1.0, %v2305_v47 }
 0x3bf   : > { %v1452_v50 = vmul.f32 %v2307_v48, %v1449_v46  ;;  %vm1457_vm7 = vweird.f32 %v2307_v48 }
 0x3c0   : > { %2308 = vrcp.f32 %v1450_v49  ;;  %vm1458_vm9 = vmor %vm1456_vm8, %vm1457_vm7  ;;  %v1477_v62 = vand.u32 2147483648, %v1450_v49  ;;  %v1475_v0 = vand.u32 2147483647, %v1450_v49  ;;  %vm1471_vm12 = vweird.f32 %v1450_v49 }
 0x3c1   : > { %v1453_v51 = vsub.f32 1.0, %v1452_v50 }
 0x3c2   : > { %v1478_v4 = vor.u32 1.1754944e-38, %v1477_v62  ;;  %vm1476_vm14 = vcmp.eq.f32.partialorder %v1475_v0, 8.507059e+37 }
 0x3c3   : > { %v1454_v53 = vmul.f32 %v2307_v48, %v1453_v51 }
 0x3c5   : > { %v1455_v55 = vadd.f32 %v2307_v48, %v1454_v53 }
 0x3c6   : > { %v2309_v56 = vpop.eup %2308 }
 0x3c7   : > { %v1459_v58 = vsel %vm1458_vm9, %v2307_v48, %v1455_v55  ;;  %v1467_v59 = vmul.f32 %v2309_v56, %v1450_v49  ;;  %vm1472_vm11 = vweird.f32 %v2309_v56 }
 0x3c8   : > { %v2909_v60 = vsel %vm1461_vm10, %v1463_v57, %v1459_v58  ;;  %vm1473_vm13 = vmor %vm1471_vm12, %vm1472_vm11 }
 0x3c9   : > { %v1468_v61 = vsub.f32 1.0, %v1467_v59  ;;  %1611 = vrot.lane.b32.xlu1 %v2909_v60, %s3046_s17  ;;  %1486 = vrot.lane.b32.xlu2 %v2909_v60, %s2378_s27 }
 0x3cb   : > { %v1469_v63 = vmul.f32 %v2309_v56, %v1468_v61 }
 0x3cd   : > { %v1470_v1 = vadd.f32 %v2309_v56, %v1469_v63 }
 0x3cf   : > { %v1474_v6 = vsel %vm1473_vm13, %v2309_v56, %v1470_v1 }
 0x3d0   : > { %v1479_v8 = vsel %vm1476_vm14, %v1478_v4, %v1474_v6 }
 0x3d1   : > { %1547 = vrot.lane.b32.xlu0 %v1479_v8, %s3047_s25  ;;  %1710 = vrot.lane.b32.xlu1 %v2909_v60, %s2384_s26 }
 0x3d2   : > { %1545 = vrot.lane.b32.xlu2 %v2909_v60, %s3047_s25  ;;  %s2328_s25 = sshra.s32 %s1916_s24, 4  ;;  %s2329_s25 = int_to_ptr.hbm [resolvable:$true] %s2328_s25 }
 0x3d3   : > { %p2335_p0 = scmp.lt.s32.totalorder %s2329_s25, %s3034_s9 }
 0x3d9   : > { %1580 = vrot.lane.b32.xlu0 %v1479_v8, %s3045_s15  ;;  %1488 = vrot.lane.b32.xlu1 %v1479_v8, %s2378_s27  ;;  %s2388_s27 = smov 117  }
 0x3da   : > { %1578 = vrot.lane.b32.xlu2 %v2909_v60, %s3045_s15  ;;  %s2389_s15 = smov 119  }
 0x3e1   : > { %1646 = vrot.lane.b32.xlu0 %v1479_v8, %s3048_s29  ;;  %1743 = vrot.lane.b32.xlu1 %v2909_v60, %s2385_s30 }
 0x3e2   : > { %1644 = vrot.lane.b32.xlu2 %v2909_v60, %s3048_s29 }
 0x3e9   : > { %1679 = vrot.lane.b32.xlu0 %v1479_v8, %s2386_s28  ;;  %1613 = vrot.lane.b32.xlu1 %v1479_v8, %s3046_s17 }
 0x3ea   : > { %1677 = vrot.lane.b32.xlu2 %v2909_v60, %s2386_s28  ;;  %s2334_s28 = scalar_lea.hbm %s3034_s9, 2 }
 0x3f1   : > { %1811 = vrot.lane.b32.xlu0 %v1479_v8, %s2387_s10  ;;  %1712 = vrot.lane.b32.xlu1 %v1479_v8, %s2384_s26  ;;  %s2330_s26 = scalar_lea.hbm %s2329_s25, 1 }
 0x3f2   : > { %1809 = vrot.lane.b32.xlu2 %v2909_v60, %s2387_s10  ;;  %p2331_p11 = scmp.ne.s32.totalorder %s2329_s25, %s2330_s26  ;;  %p2336_p1 = scmp.lt.s32.totalorder %s2334_s28, %s2330_s26 }
 0x3f4   : > { %p2332_p12 = pnand %p2331_p11, %p2481_p5  ;;  %p2337_p2 = por %p2336_p1, %p2335_p0 }
 0x3f6   : > { %p2333_p13 = pneg %p2332_p12 }
 0x3f8   : > { %p2338_p3 = pnand %p2337_p2, %p2333_p13 }
 0x3f9   : > { %1844 = vrot.lane.b32.xlu0 %v1479_v8, %s2388_s27  ;;  %1745 = vrot.lane.b32.xlu1 %v1479_v8, %s2385_s30 }
 0x3fa   : > { %1778 = vrot.lane.b32.xlu2 %v1479_v8, %s2389_s15 }
 0x401   : > { %1842 = vrot.lane.b32.xlu0 %v2909_v60, %s2388_s27  ;;  %1776 = vrot.lane.b32.xlu1 %v2909_v60, %s2389_s15  ;;  %s325_s27 = sand.u32 1, %s2368_s12  }
 0x402   : > { %1876 = vperm.xlu2 %2264, %v1873_v9   ;;  %s326_s22 = scalar_lea.vmem [#allocation3], %s325_s27  ;;  %s1903_s8 = scalar_lea.sflag [#allocation4], %s325_s27 }
 0x403   : > { %s1913_s23 = sshll.u32 %s326_s22, 4  ;;  %s1914_s23 = int_to_ptr.vmem [resolvable:$true] %s1913_s23 }
 0x423   : > { %v1487_v2 = vpop.permute.xlu2 %1486 }
 0x42c   : > { %v1546_v5 = vpop.permute.xlu2 %1545 }
 0x434   : > { %v1579_v10 = vpop.permute.xlu2 %1578 }
 0x43b   : > { %v1612_v11 = vpop.permute.xlu1 %1611 }
 0x43c   : > { %v1645_v3 = vpop.permute.xlu2 %1644 }
 0x443   : > { %v1548_v7 = vpop.permute.xlu0 %1547  ;;  %v1711_v12 = vpop.permute.xlu1 %1710 }
 0x444   : > { %2078 = vmatpush.msk.msrb.mxu0 %vm1495_vm15, %v1548_v7  ;;  %v1678_v14 = vpop.permute.xlu2 %1677 }
 0x446   : > { %1570 = vmatpush.msrb.mxu0 %v1546_v5 }
 0x447   : > { %2079 = vmatmul.msk.f32.vlgmr.msrb.gmra.mxu0 %vm1491_vm0, %v2077_v13 }
 0x44b   : > { %v1581_v16 = vpop.permute.xlu0 %1580  ;;  %v1489_v18 = vpop.permute.xlu1 %1488 }
 0x44c   : > { %2073 = vmatpush.msk.msrb.mxu3 %vm1495_vm15, %v1489_v18  ;;  %2081 = vmatpush.msk.msrb.mxu1 %vm1495_vm15, %v1581_v16  ;;  %v1810_v21 = vpop.permute.xlu2 %1809 }
 0x44e   : > { %1513 = vmatpush.msrb.mxu3 %v1487_v2  ;;  %1603 = vmatpush.msrb.mxu1 %v1579_v10 }
 0x44f   : > { %2082 = vmatmul.msk.f32.vlgmr.msrb.gmra.mxu1 %vm1491_vm0, %v2080_v15  ;;  %2074 = vmatmul.msk.f32.vlgmr.msrb.gmra.mxu3 %vm1491_vm0, %v2072_v19 }
 0x450   : > { %2075 = vmatpush.msk.msra.mxu3 %vm1495_vm15, %v1479_v8 }
 0x452   : > { %1538 = vmatpush.msra.mxu3 %v2909_v60 }
 0x453   : > { %v1647_v20 = vpop.permute.xlu0 %1646  ;;  %v1744_v17 = vpop.permute.xlu1 %1743 }
 0x454   : > { %2087 = vmatpush.msk.msra.mxu0 %vm1495_vm15, %v1647_v20  ;;  %v1779_v28 = vpop.permute.xlu2 %1778 }
 0x456   : > { %1669 = vmatpush.msra.mxu0 %v1645_v3 }
 0x457   : > { %2088 = vmatmul.msk.f32.vlgmr.msra.gmra.mxu0 %vm1491_vm0, %v2086_v22  ;;  %2076 = vmatmul.msk.f32.vlgmr.msra.gmra.mxu3 %vm1491_vm0, %v1481_v23 }
 0x45b   : > { %v1680_v24 = vpop.permute.xlu0 %1679  ;;  %v1614_v25 = vpop.permute.xlu1 %1613 }
 0x45c   : > { %2084 = vmatpush.msk.msrb.mxu3 %vm1495_vm15, %v1614_v25  ;;  %2090 = vmatpush.msk.msra.mxu1 %vm1495_vm15, %v1680_v24  ;;  %v1877_v60 = vpop.permute.xlu2 %1876 }
 0x45d   : > { %v1879_v63 = vperm.slane %v1877_v60, 0 }
 0x45e   : > { %1636 = vmatpush.msrb.mxu3 %v1612_v11  ;;  %1702 = vmatpush.msra.mxu1 %v1678_v14 }
 0x45f   : > { %2085 = vmatmul.msk.f32.vlgmr.msrb.gmra.mxu3 %vm1491_vm0, %v2083_v26  ;;  %2091 = vmatmul.msk.f32.vlgmr.msra.gmra.mxu1 %vm1491_vm0, %v2089_v27 }
 0x460   : > { %2099 = vmatpush.msk.msrb.mxu1 %vm1495_vm15, %v1779_v28 }
 0x463   : > { %v1812_v29 = vpop.permute.xlu0 %1811  ;;  %v1713_v30 = vpop.permute.xlu1 %1712 }
 0x464   : > { %2093 = vmatpush.msk.msra.mxu3 %vm1495_vm15, %v1713_v30  ;;  %2102 = vmatpush.msk.msra.mxu2 %vm1495_vm15, %v1812_v29 }
 0x466   : > { %1735 = vmatpush.msra.mxu3 %v1711_v12  ;;  %1834 = vmatpush.msra.mxu2 %v1810_v21 }
 0x467   : > { %2103 = vmatmul.msk.f32.vlgmr.msra.gmra.mxu2 %vm1491_vm0, %v2101_v32  ;;  %2094 = vmatmul.msk.f32.vlgmr.msra.gmra.mxu3 %vm1491_vm0, %v2092_v31 }
 0x46b   : > { %v1845_v34 = vpop.permute.xlu0 %1844  ;;  %v1746_v35 = vpop.permute.xlu1 %1745 }
 0x46c   : > { %2096 = vmatpush.msk.msrb.mxu0 %vm1495_vm15, %v1746_v35  ;;  %2105 = vmatpush.msk.msrb.mxu3 %vm1495_vm15, %v1845_v34 }
 0x46e   : > { %1768 = vmatpush.msrb.mxu0 %v1744_v17 }
 0x46f   : > { %2097 = vmatmul.msk.f32.vlgmr.msrb.gmra.mxu0 %vm1491_vm0, %v2095_v36 }
 0x473   : > { %v1843_v37 = vpop.permute.xlu0 %1842  ;;  %v1777_v39 = vpop.permute.xlu1 %1776 }
 0x474   : > { %1801 = vmatpush.msrb.mxu1 %v1777_v39  ;;  %1867 = vmatpush.msrb.mxu3 %v1843_v37 }
 0x475   : > { %2106 = vmatmul.msk.f32.vlgmr.msrb.gmra.mxu3 %vm1491_vm0, %v2104_v38  ;;  %2100 = vmatmul.msk.f32.vlgmr.msrb.gmra.mxu1 %vm1491_vm0, %v2098_v33 }
 0x4c4   : > { %v1572_v41 = vpop.f32.mrf.mxu0 }
 0x4cc   : > { %v1605_v45 = vpop.f32.mrf.mxu1 }
 0x4d2   : > { %v1515_v40 = vpop.f32.mrf.mxu3 }
 0x4d4   : > { %v1671_v49 = vpop.f32.mrf.mxu0 }
 0x4da   : > { %v1540_v42 = vpop.f32.mrf.mxu3 }
 0x4db   : > { %v1541_v43 = vadd.f32 %v1540_v42, %v1515_v40 }
 0x4dc   : > { %v1704_v51 = vpop.f32.mrf.mxu1 }
 0x4dd   : > { %v1575_v44 = vadd.f32 %v1572_v41, %v1541_v43 }
 0x4df   : > { %v1608_v46 = vadd.f32 %v1605_v45, %v1575_v44 }
 0x4e2   : > { %v1638_v47 = vpop.f32.mrf.mxu3 }
 0x4e3   : > { %v1641_v48 = vadd.f32 %v1638_v47, %v1608_v46 }
 0x4e5   : > { %v1674_v50 = vadd.f32 %v1671_v49, %v1641_v48 }
 0x4e7   : > { %v1707_v52 = vadd.f32 %v1704_v51, %v1674_v50 }
 0x4ea   : > { %v1737_v53 = vpop.f32.mrf.mxu3  ;;  %v1836_v59 = vpop.f32.mrf.mxu2 }
 0x4eb   : > { %v1740_v54 = vadd.f32 %v1737_v53, %v1707_v52 }
 0x4ec   : > { %v1770_v55 = vpop.f32.mrf.mxu0 }
 0x4ed   : > { %v1773_v56 = vadd.f32 %v1770_v55, %v1740_v54 }
 0x4f2   : > { %v1803_v57 = vpop.f32.mrf.mxu1 }
 0x4f3   : > { %v1806_v58 = vadd.f32 %v1803_v57, %v1773_v56 }
 0x4f5   : > { %v1839_v61 = vadd.f32 %v1836_v59, %v1806_v58 }
 0x4f8   : > { %v1869_v62 = vpop.f32.mrf.mxu3 }
 0x4f9   : > { %v1872_v0 = vadd.f32 %v1869_v62, %v1839_v61 }
 0x4fb   : > { %v1880_v1 = vadd.f32 %v1879_v63, %v1872_v0 }
 0x4fd   : > { %v2107_v4 = vmul.f32 -1.442695, %v1880_v1 }
 0x4ff   : > { %2310 = vpow2.f32 %v2107_v4 }
 0x505   : > { %v2311_v6 = vpop.eup %2310 }
 0x506   : > { %v1884_v8 = vadd.f32 1.0, %v2311_v6 }
 0x508   : > { %2312 = vrcp.f32 %v1884_v8  ;;  %v1896_v10 = vand.u32 2147483648, %v1884_v8  ;;  %v1894_v3 = vand.u32 2147483647, %v1884_v8  ;;  %vm1890_vm2 = vweird.f32 %v1884_v8 }
 0x50a   : > { %v1897_v12 = vor.u32 1.1754944e-38, %v1896_v10  ;;  %vm1895_vm5 = vcmp.eq.f32.partialorder %v1894_v3, 8.507059e+37 }
 0x50e   : > { %v2313_v9 = vpop.eup %2312 }
 0x50f   : > { %v1886_v2 = vmul.f32 %v2313_v9, %v1884_v8  ;;  %vm1891_vm1 = vweird.f32 %v2313_v9 }
 0x510   : > { %vm1892_vm3 = vmor %vm1890_vm2, %vm1891_vm1 }
 0x511   : > { %v1887_v5 = vsub.f32 1.0, %v1886_v2 }
 0x513   : > { %v1888_v11 = vmul.f32 %v2313_v9, %v1887_v5 }
 0x515   : > { %v1889_v7 = vadd.f32 %v2313_v9, %v1888_v11 }
 0x517   : > { %v1893_v13 = vsel %vm1892_vm3, %v2313_v9, %v1889_v7 }
 0x518   : > { %v1898_v14 = vsel %vm1895_vm5, %v1897_v12, %v1893_v13 }
 0x519   : > { %1901 = vst.msk [vmem:[%s326_s22] sm:$0x1] %vm1900_vm4, %v1898_v14 }
 0x51a   : > { %2341 = shalt.err (!%p2338_p3)
}
 0x51b   : > { %2111 = dma.vmem_to_hbm [thread:$0]  (%p2481_p5), %s1914_s23, 16, %s1916_s24, %s1903_s8  }
 0x51c PF: > { %p2117_p4 = scmp.ge.s32.totalorder %s2376_s14, 2  ;;  %s1927_s27 = sand.u32 1, %s2364_s11  }
 0x51d   : > { %s1928_s17 = scalar_lea.sflag [#allocation4], %s1927_s27 }
 0x51e   : > { %p2114_p7 = pnand %p2117_p4, %p2485_p6 }
 0x520   : > { %p2115_p8 = pneg %p2114_p7 }
 0x522   : > { %2359 = dma.done.wait (%p2115_p8), %s1928_s17, 16  }
 0x523   : > { %2361 = vsyncadd (%p2115_p8), %s1928_s17, 4294967280  ;;  %p21_p9 = scmp.ge.s32.totalorder %s2468_s16, 4   ;;  %s3049_s11 = smov %s2368_s12 }
 0x524   : > { %s3050_s12 = smov %s2372_s13  ;;  %s3051_s13 = smov %s2479_s19 }
 0x525   : > { %s3052_s14 = smov %s2468_s16  ;;  %23 = sbr.rel (!%p21_p9) target bundleno = 6 (0x6), region = 112 }
 0x52a   :  { %1933 = vsyncpa [#allocation4], 1 }
 0x52b   :  { %1935 = vsyncpa [#allocation4 + $0x1], 1 }

</bundles_post_ra>
